<compile_context>
chip_gen: v7x
topology: tpu7x:2x2x1
jax: 0.10.0
libtpu: 0.0.40
codegen_flags: <defaults>
</compile_context>

<pallas_src>
import jax
import jax.numpy as jnp
from jax import lax
from jax.experimental import pallas as pl
from jax.experimental.pallas import tpu as pltpu

INF = 1e20        # same sentinel as the original codebase
TILE_B = 8        # batch rows per grid step (8-sublane-dense output stores)
LANE = 128        # sequence padded to a multiple of 128 (lane-dense tiles)


def _pick_tile_s(s_pad, per_s_bytes, budget=8 << 20):
    """Largest lane-dense seq tile whose per-step working set fits `budget`."""
    for t in (2048, 1024, 512, 256, 128):
        if s_pad % t == 0 and TILE_B * t * per_s_bytes <= budget:
            return t
    return LANE


def _pad_axis(x, axis, target):
    pad = target - x.shape[axis]
    if pad == 0:
        return x
    widths = [(0, 0)] * x.ndim
    widths[axis] = (0, pad)
    return jnp.pad(x, widths)


def _make_dot_kernel(has_add, has_mask):
    """simple/mul: att[b,s] = <mem[b,s,:], qv[b,:]> (qv = q or q@W, hoisted)."""
    def kernel(*refs):
        it = iter(refs)
        mem_ref = next(it)                      # (TILE_B, ts, Dm)
        q_ref = next(it)                        # (TILE_B, Dm)
        add_ref = next(it) if has_add else None  # (TILE_B, ts)
        mask_ref = next(it) if has_mask else None
        out_ref = next(it)                      # (TILE_B, ts)

        mem = mem_ref[...].astype(jnp.float32)
        q = q_ref[...].astype(jnp.float32)
        # HBM-bound mat-vec: VPU multiply + XLU lane reduce; result lands
        # directly in the dense (TILE_B, ts) store layout.
        att = jnp.sum(mem * q[:, None, :], axis=-1)
        if has_add:
            att = att + add_ref[...].astype(jnp.float32)
        if has_mask:
            m = mask_ref[...].astype(jnp.float32)
            att = m * att - (1.0 - m) * INF
        out_ref[...] = att.astype(out_ref.dtype)
    return kernel


def _make_add_kernel(has_add, has_mask):
    """add: att = tanh(mem@W2 + (q@W) (+addition)) @ W3, with q@W hoisted."""
    def kernel(*refs):
        it = iter(refs)
        mem_ref = next(it)                      # (TILE_B, ts, Dm)
        qw_ref = next(it)                       # (TILE_B, H)
        w2_ref = next(it)                       # (Dm, H)  VMEM-resident
        w3_ref = next(it)                       # (1, H)   VMEM-resident
        add_ref = next(it) if has_add else None  # (TILE_B, ts, H)
        mask_ref = next(it) if has_mask else None
        out_ref = next(it)                      # (TILE_B, ts)

        tb, ts, dm = mem_ref.shape
        h = w2_ref.shape[1]

        # (TILE_B*ts, Dm) @ (Dm, H) on the MXU with f32 accumulation.
        # TODO(synk): optional bf16 cast of mem/W2 for full-rate MXU on v5e/v6e.
        mem2d = mem_ref[...].reshape(tb * ts, dm).astype(w2_ref.dtype)
        mem_w2 = jnp.dot(mem2d, w2_ref[...], preferred_element_type=jnp.float32)
        att3 = mem_w2.reshape(tb, ts, h) + qw_ref[...].astype(jnp.float32)[:, None, :]
        if has_add:
            att3 = att3 + add_ref[...].astype(jnp.float32)
        att3 = jnp.tanh(att3)                   # EUP
        # Final (..., H) x (H,) projection as VPU mul + lane reduce -> (TILE_B, ts).
        att = jnp.sum(att3 * w3_ref[...].astype(jnp.float32)[None], axis=-1)
        if has_mask:
            m = mask_ref[...].astype(jnp.float32)
            att = m * att - (1.0 - m) * INF
        out_ref[...] = att.astype(out_ref.dtype)
    return kernel


def attention_forward(attn_type, query_embed, in_memory_embed, params=None,
                      attn_mask=None, addition_vec=None):
    """Pallas-backed equivalent of Attention.forward. Returns (B, S) float32."""
    params = params or {}
    if attn_type not in ("simple", "mul", "add"):
        raise RuntimeError("Unknown attn_type: {}".format(attn_type))

    B, S, Dm = in_memory_embed.shape
    has_add = addition_vec is not None
    has_mask = attn_mask is not None

    # Hoist the tiny query projection (O(B*Dq*H)) out of the kernel so 'mul'
    # collapses onto the 'simple' path; no per-tile M=1 matmul remains.
    if attn_type == "simple":
        qv = query_embed
    else:
        qv = jnp.matmul(query_embed, params["W"], precision=lax.Precision.HIGHEST)
    H = params["W2"].shape[1] if attn_type == "add" else None

    # Pad batch to TILE_B and sequence to a multiple of 128: dense 8x128 stores
    # and bounded tiles for ragged S. Padding is sliced off the output.
    Bp = pl.cdiv(B, TILE_B) * TILE_B
    Sp = pl.cdiv(S, LANE) * LANE

    mem_p = _pad_axis(_pad_axis(in_memory_embed, 0, Bp), 1, Sp)
    qv_p = _pad_axis(qv, 0, Bp)

    # Per-(batch-row, seq-position) working-set estimate: streamed inputs are
    # double-buffered, plus f32 intermediates -> per-attn_type tile budgeting.
    mem_it = in_memory_embed.dtype.itemsize
    per_s = Dm * mem_it * 2 + 16
    if attn_type == "add":
        per_s += 3 * H * 4
        if has_add:
            per_s += H * addition_vec.dtype.itemsize * 2
    else:
        per_s += Dm * 4
        if has_add:
            per_s += addition_vec.dtype.itemsize * 2
    tile_s = _pick_tile_s(Sp, per_s)
    grid = (Bp // TILE_B, Sp // tile_s)

    inputs = [mem_p, qv_p]
    in_specs = [
        pl.BlockSpec((TILE_B, tile_s, Dm), lambda bi, si: (bi, si, 0)),
        pl.BlockSpec((TILE_B, qv_p.shape[1]), lambda bi, si: (bi, 0)),
    ]
    if attn_type == "add":
        W2 = params["W2"]
        W3 = params["W3"].reshape(1, -1)                    # (1, H) row vector
        inputs += [W2, W3]
        in_specs += [pl.BlockSpec(W2.shape, lambda bi, si: (0, 0)),
                     pl.BlockSpec(W3.shape, lambda bi, si: (0, 0))]
    if has_add:
        add_p = _pad_axis(_pad_axis(addition_vec, 0, Bp), 1, Sp)
        inputs.append(add_p)
        if attn_type == "add":
            # TODO(synk): only a (B, S, H) addition_vec is supported on the
            # 'add' path; general broadcastable shapes are not implemented.
            in_specs.append(pl.BlockSpec((TILE_B, tile_s, H),
                                         lambda bi, si: (bi, si, 0)))
        else:
            in_specs.append(pl.BlockSpec((TILE_B, tile_s),
                                         lambda bi, si: (bi, si)))
    if has_mask:
        mask_p = _pad_axis(_pad_axis(attn_mask, 0, Bp), 1, Sp)
        inputs.append(mask_p)
        in_specs.append(pl.BlockSpec((TILE_B, tile_s), lambda bi, si: (bi, si)))

    if attn_type == "add":
        kernel = _make_add_kernel(has_add, has_mask)
    else:
        kernel = _make_dot_kernel(has_add, has_mask)

    out = pl.pallas_call(
        kernel,
        out_shape=jax.ShapeDtypeStruct((Bp, Sp), jnp.float32),
        grid=grid,
        in_specs=in_specs,
        out_specs=pl.BlockSpec((TILE_B, tile_s), lambda bi, si: (bi, si)),
        compiler_params=pltpu.CompilerParams(
            dimension_semantics=("parallel", "parallel"),
            vmem_limit_bytes=48 * 1024 * 1024,   # safe on v7x (64 MiB physical)
        ),
    )(*inputs)
    return out[:B, :S]


# ----------------------------------------------------------------------------
# Deterministic parameter init (xavier_uniform, as in the module __init__).
# ----------------------------------------------------------------------------
def xavier_uniform(key, shape):
    fan_in, fan_out = shape
    bound = (6.0 / (fan_in + fan_out)) ** 0.5
    return jax.random.uniform(key, shape, jnp.float32, -bound, bound)


def init_params(key, hidden_size, h_state_embed_size=None,
                in_memory_embed_size=None, attn_type="simple"):
    h_state_embed_size = h_state_embed_size or hidden_size
    in_memory_embed_size = in_memory_embed_size or hidden_size
    params = {}
    if attn_type in ("mul", "add"):
        k1, k2, k3 = jax.random.split(key, 3)
        params["W"] = xavier_uniform(k1, (h_state_embed_size, hidden_size))
        if attn_type == "add":
            params["W2"] = xavier_uniform(k2, (in_memory_embed_size, hidden_size))
            params["W3"] = xavier_uniform(k3, (hidden_size, 1))
    return params


# ----------------------------------------------------------------------------
# Pure-JAX reference for correctness checking.
# ----------------------------------------------------------------------------
def ref_forward(attn_type, q, mem, params, attn_mask=None, addition_vec=None):
    pr = jax.lax.Precision.HIGHEST
    if attn_type == "simple":
        att = jnp.einsum("bsd,bd->bs", mem, q, precision=pr)
        if addition_vec is not None:
            att = att + addition_vec
    elif attn_type == "mul":
        qW = jnp.matmul(q, params["W"], precision=pr)
        att = jnp.einsum("bsd,bd->bs", mem, qW, precision=pr)
        if addition_vec is not None:
            att = att + addition_vec
    else:  # add
        att = (jnp.einsum("bsd,dh->bsh", mem, params["W2"], precision=pr)
               + jnp.matmul(q, params["W"], precision=pr)[:, None, :])
        if addition_vec is not None:
            att = att + addition_vec
        att = jnp.tanh(att)
        att = jnp.einsum("bsh,ho->bs", att, params["W3"], precision=pr)
    if attn_mask is not None:
        att = attn_mask * att - (1.0 - attn_mask) * INF
    return att


if __name__ == "__main__":
    ok = True

    # Config 1: small shapes, mask + addition (exercises batch+seq padding).
    B, S, hidden = 2, 8, 32
    key = jax.random.PRNGKey(0)
    kq, km, ka, ka3, kmask, kp = jax.random.split(key, 6)
    query_embed = jax.random.normal(kq, (B, hidden), jnp.float32)
    in_memory_embed = jax.random.normal(km, (B, S, hidden), jnp.float32)
    add2d = jax.random.normal(ka, (B, S), jnp.float32)
    add3d = 0.1 * jax.random.normal(ka3, (B, S, hidden), jnp.float32)
    attn_mask = (jax.random.uniform(kmask, (B, S)) > 0.3).astype(jnp.float32)

    for attn_type in ("simple", "mul", "add"):
        params = init_params(kp, hidden, attn_type=attn_type)
        add = add2d if attn_type in ("simple", "mul") else add3d
        out = attention_forward(attn_type, query_embed, in_memory_embed, params,
                                attn_mask=attn_mask, addition_vec=add)
        out = jax.block_until_ready(out)
        ref = ref_forward(attn_type, query_embed, in_memory_embed, params,
                          attn_mask=attn_mask, addition_vec=add)
        if not jnp.allclose(out, ref, rtol=1e-3, atol=1e-3):
            ok = False
            print(f"MISMATCH (config1) attn_type={attn_type}")

    # Config 2: ragged batch/seq, no mask, no addition.
    B2, S2, hidden2 = 3, 200, 64
    k2q, k2m, k2p = jax.random.split(jax.random.PRNGKey(1), 3)
    q2 = jax.random.normal(k2q, (B2, hidden2), jnp.float32)
    m2 = jax.random.normal(k2m, (B2, S2, hidden2), jnp.float32)
    for attn_type in ("simple", "mul", "add"):
        params = init_params(k2p, hidden2, attn_type=attn_type)
        out = attention_forward(attn_type, q2, m2, params)
        out = jax.block_until_ready(out)
        ref = ref_forward(attn_type, q2, m2, params)
        if not jnp.allclose(out, ref, rtol=1e-3, atol=1e-3):
            ok = False
            print(f"MISMATCH (config2) attn_type={attn_type}")

    if ok:
        print("KERNEL_OK")
</pallas_src>

<mosaic_0001>
module attributes {stable_mosaic.version = 11 : i64} {
  func.func @kernel(%arg0: i32, %arg1: i32, %arg2: memref<8x128x32xf32, #tpu.memory_space<vmem>>, %arg3: memref<8x32xf32, #tpu.memory_space<vmem>>, %arg4: memref<8x128xf32, #tpu.memory_space<vmem>>, %arg5: memref<8x128xf32, #tpu.memory_space<vmem>>, %arg6: memref<8x128xf32, #tpu.memory_space<vmem>>) attributes {dimension_semantics = [#tpu.dimension_semantics<parallel>, #tpu.dimension_semantics<parallel>], iteration_bounds = array<i64: 1, 1>, scalar_prefetch = 0 : i64, scratch_operands = 0 : i64, tpu.core_type = #tpu.core_type<tc>, window_params = [{transform_indices = @transform_0, window_bounds = array<i64: 8, 128, 32>}, {transform_indices = @transform_1, window_bounds = array<i64: 8, 32>}, {transform_indices = @transform_2, window_bounds = array<i64: 8, 128>}, {transform_indices = @transform_3, window_bounds = array<i64: 8, 128>}, {transform_indices = @transform_4, window_bounds = array<i64: 8, 128>}]} {
    %c0 = arith.constant 0 : index
    %c0_0 = arith.constant 0 : index
    %c0_1 = arith.constant 0 : index
    %0 = vector.load %arg2[%c0, %c0_0, %c0_1] : memref<8x128x32xf32, #tpu.memory_space<vmem>>, vector<8x128x32xf32>
    %c0_2 = arith.constant 0 : index
    %c0_3 = arith.constant 0 : index
    %1 = vector.load %arg3[%c0_2, %c0_3] : memref<8x32xf32, #tpu.memory_space<vmem>>, vector<8x32xf32>
    %2 = vector.shape_cast %1 : vector<8x32xf32> to vector<8x1x32xf32>
    %3 = vector.broadcast %2 : vector<8x1x32xf32> to vector<8x128x32xf32>
    %4 = arith.mulf %0, %3 : vector<8x128x32xf32>
    %cst = arith.constant dense<0.000000e+00> : vector<8x128xf32>
    %5 = vector.multi_reduction <add>, %4, %cst [2] : vector<8x128x32xf32> to vector<8x128xf32>
    %c0_4 = arith.constant 0 : index
    %c0_5 = arith.constant 0 : index
    %6 = vector.load %arg4[%c0_4, %c0_5] : memref<8x128xf32, #tpu.memory_space<vmem>>, vector<8x128xf32>
    %7 = arith.addf %5, %6 : vector<8x128xf32>
    %c0_6 = arith.constant 0 : index
    %c0_7 = arith.constant 0 : index
    %8 = vector.load %arg5[%c0_6, %c0_7] : memref<8x128xf32, #tpu.memory_space<vmem>>, vector<8x128xf32>
    %9 = arith.mulf %8, %7 : vector<8x128xf32>
    %cst_8 = arith.constant 1.000000e+00 : f32
    %10 = vector.broadcast %cst_8 : f32 to vector<8x128xf32>
    %11 = arith.subf %10, %8 : vector<8x128xf32>
    %cst_9 = arith.constant 1.000000e+20 : f32
    %12 = vector.broadcast %cst_9 : f32 to vector<8x128xf32>
    %13 = arith.mulf %11, %12 : vector<8x128xf32>
    %14 = arith.subf %9, %13 : vector<8x128xf32>
    %c0_10 = arith.constant 0 : index
    %c0_11 = arith.constant 0 : index
    %15 = vector.load %arg6[%c0_10, %c0_11] : memref<8x128xf32, #tpu.memory_space<vmem>>, vector<8x128xf32>
    tpu.vector_store %arg6[%c0_10, %c0_11], %14 {strides = array<i32>} : memref<8x128xf32, #tpu.memory_space<vmem>>, vector<8x128xf32>,
    return
  }
  func.func @transform_0(%arg0: i32, %arg1: i32) -> (i32, i32, i32) {
    %c0_i32 = arith.constant 0 : i32
    %c0_i32_0 = arith.constant 0 : i32
    return %arg0, %arg1, %c0_i32 : i32, i32, i32
  }
  func.func @transform_1(%arg0: i32, %arg1: i32) -> (i32, i32) {
    %c0_i32 = arith.constant 0 : i32
    %c0_i32_0 = arith.constant 0 : i32
    return %arg0, %c0_i32 : i32, i32
  }
  func.func @transform_2(%arg0: i32, %arg1: i32) -> (i32, i32) {
    %c0_i32 = arith.constant 0 : i32
    return %arg0, %arg1 : i32, i32
  }
  func.func @transform_3(%arg0: i32, %arg1: i32) -> (i32, i32) {
    %c0_i32 = arith.constant 0 : i32
    return %arg0, %arg1 : i32, i32
  }
  func.func @transform_4(%arg0: i32, %arg1: i32) -> (i32, i32) {
    %c0_i32 = arith.constant 0 : i32
    return %arg0, %arg1 : i32, i32
  }
}

</mosaic_0001>

<bundles_post_ra>
// kernel: tpu_custom_call.1
= control target key start
LH: loop header
LB: loop body
LE: loop exit
PB: predicated region body
PF: predicated region fallthrough
CT: control target
= control target key end

     0   :  { %v4683_v0 = vlaneseq  ;;  %v2785_v1 = vmov 1966171168   ;;  %vm365_vm0 = vcmask 261120   ;;  %s4678_s0 = inlined_call_operand.vmem [shape: f32[8,128,32], index: 0, kind: input, shape index: {}]   ;;  %s4679_s1 = inlined_call_operand.vmem [shape: f32[8,32], index: 1, kind: input, shape index: {}]   ;;  %s4680_s2 = inlined_call_operand.vmem [shape: f32[8,128], index: 2, kind: input, shape index: {}]   ;;  %s4681_s3 = inlined_call_operand.vmem [shape: f32[8,128], index: 3, kind: input, shape index: {}]   ;;  %s4682_s4 = inlined_call_operand.hbm [shape: f32[8,128], index: 4, kind: output, shape index: {}]  }
   0x1   :  { %v150_v2 = vunpack.c.l.s4 %v2785_v1  ;;  %v146_v3 = vld [vmem:[%s4679_s1] sm:$0xff]  ;;  %v20_v11 = vld [vmem:[%s4678_s0 + $0x10] sm:$0xff]  ;;  %v21_v15 = vld [vmem:[%s4678_s0 + $0x18] sm:$0xff] }
   0x2   :  { %v2817_v4 = vshrl.u32 %v4683_v0, 7  ;;  %v148_v5 = vcombine.high %v146_v3, %v146_v3  ;;  %v18_v14 = vld [vmem:[%s4678_s0] sm:$0xff]  ;;  %v19_v16 = vld [vmem:[%s4678_s0 + $0x8] sm:$0xff]  ;;  %v25_v30 = vld [vmem:[%s4678_s0 + $0x38] sm:$0xff] }
   0x3   :  { %v151_v6 = vunpack.c.0.s8 %v150_v2  ;;  %v23_v22 = vld [vmem:[%s4678_s0 + $0x28] sm:$0xff]  ;;  %v22_v23 = vld [vmem:[%s4678_s0 + $0x20] sm:$0xff]  ;;  %v24_v31 = vld [vmem:[%s4678_s0 + $0x30] sm:$0xff] }
   0x4   :  { %4687 = vst [vmem:[#allocation5_spill] sm:$0xff] %v2817_v4  ;;  %v2824_v9 = vsub.s32 0, %v2817_v4  ;;  %v27_v36 = vld [vmem:[%s4678_s0 + $0x48] sm:$0xff]  ;;  %v26_v37 = vld [vmem:[%s4678_s0 + $0x40] sm:$0xff]  ;;  %v29_v42 = vld [vmem:[%s4678_s0 + $0x58] sm:$0xff] }
   0x5   :  { %v2820_v7 = vsub.s32 %v151_v6, %v2817_v4  ;;  %v28_v43 = vld [vmem:[%s4678_s0 + $0x50] sm:$0xff] }
   0x7   :  { %v155_v8 = vrot.slane %v146_v3, %v2820_v7  ;;  %v2827_v10 = vrot.slane %v148_v5, %v2820_v7 }
   0x9   :  { %v2833_v12 = vrot.slane %v155_v8, %v2820_v7  ;;  %v2837_v13 = vrot.slane %v2827_v10, %v2820_v7 }
   0xb   :  { %v200_v17 = vrot.slane %v2833_v12, %v2824_v9 }
   0xd   :  { %v239_v18 = vmul.f32 %v200_v17, %v20_v11  ;;  %v237_v19 = vmul.f32 %v200_v17, %v18_v14  ;;  %v240_v20 = vmul.f32 %v200_v17, %v21_v15  ;;  %v238_v21 = vmul.f32 %v200_v17, %v19_v16 }
   0xe   :  { %v242_v28 = vmul.f32 %v200_v17, %v23_v22  ;;  %v241_v29 = vmul.f32 %v200_v17, %v22_v23  ;;  %v244_v34 = vmul.f32 %v200_v17, %v25_v30  ;;  %v243_v35 = vmul.f32 %v200_v17, %v24_v31 }
   0xf   :  { %v372_v24 = vsel %vm365_vm0, %v239_v18, 0.0  ;;  %v366_v25 = vsel %vm365_vm0, %v237_v19, 0.0  ;;  %v375_v26 = vsel %vm365_vm0, %v240_v20, 0.0  ;;  %v369_v27 = vsel %vm365_vm0, %v238_v21, 0.0 }
  0x10   :  { %373 = vadd.xlane.f32.xlu1 %v372_v24  ;;  %367 = vadd.xlane.f32.xlu0 %v366_v25  ;;  %v381_v32 = vsel %vm365_vm0, %v242_v28, 0.0  ;;  %v378_v33 = vsel %vm365_vm0, %v241_v29, 0.0  ;;  %v387_v38 = vsel %vm365_vm0, %v244_v34, 0.0  ;;  %v384_v39 = vsel %vm365_vm0, %v243_v35, 0.0 }
  0x11   :  { %v246_v40 = vmul.f32 %v200_v17, %v27_v36  ;;  %v245_v41 = vmul.f32 %v200_v17, %v26_v37 }
  0x14   :  { %376 = vadd.xlane.f32.xlu1 %v375_v26  ;;  %370 = vadd.xlane.f32.xlu0 %v369_v27 }
  0x18   :  { %382 = vadd.xlane.f32.xlu1 %v381_v32  ;;  %379 = vadd.xlane.f32.xlu0 %v378_v33 }
  0x19   :  { %9 = vsyncpa [#allocation3], 0  ;;  %v163_v44 = vcombine.high %v155_v8, %v155_v8  ;;  %v393_v45 = vsel %vm365_vm0, %v246_v40, 0.0  ;;  %v390_v46 = vsel %vm365_vm0, %v245_v41, 0.0  ;;  %v248_v47 = vmul.f32 %v200_v17, %v29_v42  ;;  %v31_v49 = vld [vmem:[%s4678_s0 + $0x68] sm:$0xff]  ;;  %v30_v50 = vld [vmem:[%s4678_s0 + $0x60] sm:$0xff] }
  0x1a   :  { %v247_v48 = vmul.f32 %v200_v17, %v28_v43  ;;  %v250_v54 = vmul.f32 %v200_v17, %v31_v49  ;;  %v249_v55 = vmul.f32 %v200_v17, %v30_v50  ;;  %v33_v56 = vld [vmem:[%s4678_s0 + $0x78] sm:$0xff]  ;;  %v32_v57 = vld [vmem:[%s4678_s0 + $0x70] sm:$0xff]  ;;  %v35_v63 = vld [vmem:[%s4678_s0 + $0x88] sm:$0xff]  ;;  %v164_v32 = vcombine.high %v2827_v10, %v2827_v10 }
  0x1b   :  { %v2891_v51 = vrot.slane %v163_v44, %v2820_v7  ;;  %v399_v52 = vsel %vm365_vm0, %v248_v47, 0.0  ;;  %v252_v58 = vmul.f32 %v200_v17, %v33_v56  ;;  %v251_v61 = vmul.f32 %v200_v17, %v32_v57  ;;  %v34_v1 = vld [vmem:[%s4678_s0 + $0x80] sm:$0xff]  ;;  %v37_v8 = vld [vmem:[%s4678_s0 + $0x98] sm:$0xff]  ;;  %v36_v11 = vld [vmem:[%s4678_s0 + $0x90] sm:$0xff] }
  0x1c   :  { %388 = vadd.xlane.f32.xlu1 %v387_v38  ;;  %385 = vadd.xlane.f32.xlu0 %v384_v39  ;;  %v396_v53 = vsel %vm365_vm0, %v247_v48, 0.0  ;;  %v405_v59 = vsel %vm365_vm0, %v250_v54, 0.0  ;;  %v402_v60 = vsel %vm365_vm0, %v249_v55, 0.0  ;;  %v39_v18 = vld [vmem:[%s4678_s0 + $0xa8] sm:$0xff]  ;;  %v38_v19 = vld [vmem:[%s4678_s0 + $0xa0] sm:$0xff]  ;;  %v41_v24 = vld [vmem:[%s4678_s0 + $0xb8] sm:$0xff]  ;;  %v2960_v37 = vrot.slane %v164_v32, %v2820_v7 }
  0x1d   :  { %v2905_v62 = vrot.slane %v2891_v51, %v2824_v9  ;;  %v411_v2 = vsel %vm365_vm0, %v252_v58, 0.0  ;;  %v408_v3 = vsel %vm365_vm0, %v251_v61, 0.0  ;;  %v40_v25 = vld [vmem:[%s4678_s0 + $0xb0] sm:$0xff]  ;;  %v43_v30 = vld [vmem:[%s4678_s0 + $0xc8] sm:$0xff]  ;;  %v42_v31 = vld [vmem:[%s4678_s0 + $0xc0] sm:$0xff]  ;;  %v193_v44 = vcombine.high %v2833_v12, %v2833_v12 }
  0x1e   :  { %v45_v38 = vld [vmem:[%s4678_s0 + $0xd8] sm:$0xff]  ;;  %v44_v10 = vld [vmem:[%s4678_s0 + $0xd0] sm:$0xff]  ;;  %v47_v7 = vld [vmem:[%s4678_s0 + $0xe8] sm:$0xff]  ;;  %vm2068_vm1 = vcmask 130112   ;;  %vm2075_vm2 = vcmask 195712   ;;  %vm2082_vm3 = vcmask 261312  }
  0x1f   :  { %v254_v5 = vmul.f32 %v2905_v62, %v35_v63  ;;  %v253_v6 = vmul.f32 %v2905_v62, %v34_v1  ;;  %v256_v16 = vmul.f32 %v2905_v62, %v37_v8  ;;  %v255_v17 = vmul.f32 %v2905_v62, %v36_v11  ;;  %v46_v43 = vld [vmem:[%s4678_s0 + $0xe0] sm:$0xff]  ;;  %v49_v49 = vld [vmem:[%s4678_s0 + $0xf8] sm:$0xff]  ;;  %v48_v50 = vld [vmem:[%s4678_s0 + $0xf0] sm:$0xff] }
  0x20   :  { %394 = vadd.xlane.f32.xlu1 %v393_v45  ;;  %391 = vadd.xlane.f32.xlu0 %v390_v46  ;;  %v258_v22 = vmul.f32 %v2905_v62, %v39_v18  ;;  %v257_v23 = vmul.f32 %v2905_v62, %v38_v19  ;;  %v260_v26 = vmul.f32 %v2905_v62, %v41_v24  ;;  %v51_v56 = vld [vmem:[%s4678_s0 + $0x108] sm:$0xff]  ;;  %v50_v57 = vld [vmem:[%s4678_s0 + $0x100] sm:$0xff]  ;;  %v52_v63 = vld [vmem:[%s4678_s0 + $0x110] sm:$0xff]  ;;  %vm2089_vm4 = vcmask 326912  }
  0x21   :  { %v417_v14 = vsel %vm365_vm0, %v254_v5, 0.0  ;;  %v414_v15 = vsel %vm365_vm0, %v253_v6, 0.0  ;;  %v423_v20 = vsel %vm365_vm0, %v256_v16, 0.0  ;;  %v420_v21 = vsel %vm365_vm0, %v255_v17, 0.0  ;;  %v55_v6 = vld [vmem:[%s4678_s0 + $0x128] sm:$0xff]  ;;  %v54_v8 = vld [vmem:[%s4678_s0 + $0x120] sm:$0xff] }
  0x22   :  { %v429_v27 = vsel %vm365_vm0, %v258_v22, 0.0  ;;  %v426_v28 = vsel %vm365_vm0, %v257_v23, 0.0  ;;  %v259_v29 = vmul.f32 %v2905_v62, %v40_v25  ;;  %v435_v33 = vsel %vm365_vm0, %v260_v26, 0.0  ;;  %v57_v17 = vld [vmem:[%s4678_s0 + $0x138] sm:$0xff]  ;;  %v56_v18 = vld [vmem:[%s4678_s0 + $0x130] sm:$0xff]  ;;  %v59_v23 = vld [vmem:[%s4678_s0 + $0x148] sm:$0xff] }
  0x23   :  { %v262_v35 = vmul.f32 %v2905_v62, %v43_v30  ;;  %v261_v36 = vmul.f32 %v2905_v62, %v42_v31  ;;  %v264_v41 = vmul.f32 %v2905_v62, %v45_v38  ;;  %v263_v42 = vmul.f32 %v2905_v62, %v44_v10  ;;  %v58_v24 = vld [vmem:[%s4678_s0 + $0x140] sm:$0xff]  ;;  %v60_v30 = vld [vmem:[%s4678_s0 + $0x150] sm:$0xff]  ;;  %v143_v0 = vld [vmem:[%s4678_s0 + $0x3e8] sm:$0xff] }
  0x24   :  { %400 = vadd.xlane.f32.xlu1 %v399_v52  ;;  %397 = vadd.xlane.f32.xlu0 %v396_v53  ;;  %v432_v34 = vsel %vm365_vm0, %v259_v29, 0.0  ;;  %v266_v47 = vmul.f32 %v2905_v62, %v47_v7  ;;  %v265_v48 = vmul.f32 %v2905_v62, %v46_v43  ;;  %v2991_v12 = vrot.slane %v193_v44, %v2824_v9  ;;  %v61_v29 = vld [vmem:[%s4678_s0 + $0x158] sm:$0xff]  ;;  %v64_v7 = vld [vmem:[%s4678_s0 + $0x170] sm:$0xff] }
  0x25   :  { %v441_v39 = vsel %vm365_vm0, %v262_v35, 0.0  ;;  %v438_v40 = vsel %vm365_vm0, %v261_v36, 0.0  ;;  %v447_v45 = vsel %vm365_vm0, %v264_v41, 0.0  ;;  %v444_v46 = vsel %vm365_vm0, %v263_v42, 0.0  ;;  %v63_v35 = vld [vmem:[%s4678_s0 + $0x168] sm:$0xff]  ;;  %v62_v36 = vld [vmem:[%s4678_s0 + $0x160] sm:$0xff] }
  0x26   :  { %v453_v52 = vsel %vm365_vm0, %v266_v47, 0.0  ;;  %v450_v53 = vsel %vm365_vm0, %v265_v48, 0.0  ;;  %v268_v54 = vmul.f32 %v2905_v62, %v49_v49  ;;  %v267_v55 = vmul.f32 %v2905_v62, %v48_v50  ;;  %v53_v62 = vld [vmem:[%s4678_s0 + $0x118] sm:$0xff]  ;;  %v67_v47 = vld [vmem:[%s4678_s0 + $0x188] sm:$0xff]  ;;  %v66_v48 = vld [vmem:[%s4678_s0 + $0x180] sm:$0xff] }
  0x27   :  { %v269_v61 = vmul.f32 %v2991_v12, %v50_v57  ;;  %v271_v5 = vmul.f32 %v2991_v12, %v52_v63  ;;  %v273_v16 = vmul.f32 %v2991_v12, %v54_v8  ;;  %v275_v22 = vmul.f32 %v2991_v12, %v56_v18  ;;  %v65_v42 = vld [vmem:[%s4678_s0 + $0x178] sm:$0xff] }
  0x28   :  { %406 = vadd.xlane.f32.xlu1 %v405_v59  ;;  %403 = vadd.xlane.f32.xlu0 %v402_v60  ;;  %v459_v58 = vsel %vm365_vm0, %v268_v54, 0.0  ;;  %v456_v59 = vsel %vm365_vm0, %v267_v55, 0.0  ;;  %v270_v60 = vmul.f32 %v2991_v12, %v51_v56  ;;  %v195_v38 = vcombine.high %v2891_v51, %v2891_v51  ;;  %v68_v54 = vld [vmem:[%s4678_s0 + $0x190] sm:$0xff] }
  0x29   :  { %v480_v26 = vsel %vm365_vm0, %v275_v22, 0.0  ;;  %v281_v41 = vmul.f32 %v2991_v12, %v62_v36  ;;  %v284_v51 = vmul.f32 %v2991_v12, %v65_v42  ;;  %vm2096_vm5 = vcmask 392512  }
  0x2a   :  { %v465_v1 = vsel %vm365_vm0, %v270_v60, 0.0  ;;  %v70_v60 = vld [vmem:[%s4678_s0 + $0x1a0] sm:$0xff]  ;;  %vm2103_vm6 = vcmask 458112   ;;  %vm2110_vm7 = vcmask 523712   ;;  %vm2117_vm8 = vcmask 589312  }
  0x2b   :  { %v498_v44 = vsel %vm365_vm0, %v281_v41, 0.0  ;;  %v507_v49 = vsel %vm365_vm0, %v284_v51, 0.0  ;;  %vm2124_vm9 = vcmask 654912   ;;  %vm2131_vm10 = vcmask 720512  }
  0x2c   :  { %412 = vadd.xlane.f32.xlu1 %v411_v2  ;;  %409 = vadd.xlane.f32.xlu0 %v408_v3  ;;  %v462_v2 = vsel %vm365_vm0, %v269_v61, 0.0  ;;  %v272_v3 = vmul.f32 %v2991_v12, %v53_v62  ;;  %vm2138_vm11 = vcmask 786112   ;;  %vm4686_vm12 = vcmask 851712  }
  0x2d   :  { %vm2152_vm13 = vcmask 917312   ;;  %vm2159_vm14 = vcmask 982912   ;;  %vm2166_vm15 = vcmask 1048512  }
  0x2e   :  { %v471_v11 = vsel %vm365_vm0, %v272_v3, 0.0  ;;  %v72_v3 = vld [vmem:[%s4678_s0 + $0x1b0] sm:$0xff] }
  0x30   :  { %418 = vadd.xlane.f32.xlu1 %v417_v14  ;;  %415 = vadd.xlane.f32.xlu0 %v414_v15  ;;  %v468_v14 = vsel %vm365_vm0, %v271_v5, 0.0  ;;  %v274_v15 = vmul.f32 %v2991_v12, %v55_v6 }
  0x32   :  { %v477_v19 = vsel %vm365_vm0, %v274_v15, 0.0  ;;  %v74_v15 = vld [vmem:[%s4678_s0 + $0x1c0] sm:$0xff] }
  0x34   :  { %424 = vadd.xlane.f32.xlu1 %v423_v20  ;;  %421 = vadd.xlane.f32.xlu0 %v420_v21  ;;  %v474_v20 = vsel %vm365_vm0, %v273_v16, 0.0  ;;  %v276_v21 = vmul.f32 %v2991_v12, %v57_v17 }
  0x36   :  { %v483_v25 = vsel %vm365_vm0, %v276_v21, 0.0  ;;  %v76_v21 = vld [vmem:[%s4678_s0 + $0x1d0] sm:$0xff] }
  0x38   :  { %430 = vadd.xlane.f32.xlu1 %v429_v27  ;;  %427 = vadd.xlane.f32.xlu0 %v426_v28  ;;  %v278_v27 = vmul.f32 %v2991_v12, %v59_v23  ;;  %v277_v28 = vmul.f32 %v2991_v12, %v58_v24 }
  0x3a   :  { %v489_v31 = vsel %vm365_vm0, %v278_v27, 0.0  ;;  %v486_v32 = vsel %vm365_vm0, %v277_v28, 0.0  ;;  %v78_v27 = vld [vmem:[%s4678_s0 + $0x1e0] sm:$0xff] }
  0x3c   :  { %436 = vadd.xlane.f32.xlu1 %v435_v33  ;;  %433 = vadd.xlane.f32.xlu0 %v432_v34  ;;  %v280_v33 = vmul.f32 %v2991_v12, %v61_v29  ;;  %v279_v34 = vmul.f32 %v2991_v12, %v60_v30 }
  0x3e   :  { %v495_v10 = vsel %vm365_vm0, %v280_v33, 0.0  ;;  %v80_v33 = vld [vmem:[%s4678_s0 + $0x1f0] sm:$0xff] }
  0x40   :  { %442 = vadd.xlane.f32.xlu1 %v441_v39  ;;  %439 = vadd.xlane.f32.xlu0 %v438_v40  ;;  %v492_v39 = vsel %vm365_vm0, %v279_v34, 0.0  ;;  %v282_v40 = vmul.f32 %v2991_v12, %v63_v35  ;;  %v3160_v34 = vrot.slane %v2837_v13, %v2824_v9 }
  0x42   :  { %v501_v43 = vsel %vm365_vm0, %v282_v40, 0.0  ;;  %v82_v40 = vld [vmem:[%s4678_s0 + $0x200] sm:$0xff] }
  0x43   :  { %v301_v51 = vmul.f32 %v3160_v34, %v82_v40 }
  0x44   :  { %448 = vadd.xlane.f32.xlu1 %v447_v45  ;;  %445 = vadd.xlane.f32.xlu0 %v444_v46  ;;  %v283_v45 = vmul.f32 %v2991_v12, %v64_v7  ;;  %v3080_v46 = vrot.slane %v195_v38, %v2824_v9 }
  0x46   :  { %v504_v50 = vsel %vm365_vm0, %v283_v45, 0.0  ;;  %v285_v12 = vmul.f32 %v3080_v46, %v66_v48 }
  0x48   :  { %454 = vadd.xlane.f32.xlu1 %v453_v52  ;;  %451 = vadd.xlane.f32.xlu0 %v450_v53  ;;  %v286_v52 = vmul.f32 %v3080_v46, %v67_v47  ;;  %v69_v53 = vld [vmem:[%s4678_s0 + $0x198] sm:$0xff]  ;;  %v510_v56 = vsel %vm365_vm0, %v285_v12, 0.0 }
  0x49   :  { %v288_v57 = vmul.f32 %v3080_v46, %v69_v53 }
  0x4a   :  { %v513_v55 = vsel %vm365_vm0, %v286_v52, 0.0 }
  0x4b   :  { %v519_v61 = vsel %vm365_vm0, %v288_v57, 0.0 }
  0x4c   :  { %460 = vadd.xlane.f32.xlu1 %v459_v58  ;;  %457 = vadd.xlane.f32.xlu0 %v456_v59  ;;  %v287_v58 = vmul.f32 %v3080_v46, %v68_v54  ;;  %v71_v59 = vld [vmem:[%s4678_s0 + $0x1a8] sm:$0xff] }
  0x4d   :  { %v290_v63 = vmul.f32 %v3080_v46, %v71_v59 }
  0x4e   :  { %v516_v62 = vsel %vm365_vm0, %v287_v58, 0.0 }
  0x4f   :  { %v525_v5 = vsel %vm365_vm0, %v290_v63, 0.0 }
  0x50   :  { %466 = vadd.xlane.f32.xlu1 %v465_v1  ;;  %463 = vadd.xlane.f32.xlu0 %v462_v2  ;;  %v289_v1 = vmul.f32 %v3080_v46, %v70_v60  ;;  %v73_v2 = vld [vmem:[%s4678_s0 + $0x1b8] sm:$0xff] }
  0x51   :  { %v292_v8 = vmul.f32 %v3080_v46, %v73_v2 }
  0x52   :  { %v522_v6 = vsel %vm365_vm0, %v289_v1, 0.0 }
  0x53   :  { %v531_v16 = vsel %vm365_vm0, %v292_v8, 0.0 }
  0x54   :  { %472 = vadd.xlane.f32.xlu1 %v471_v11  ;;  %469 = vadd.xlane.f32.xlu0 %v468_v14  ;;  %v291_v11 = vmul.f32 %v3080_v46, %v72_v3  ;;  %v75_v14 = vld [vmem:[%s4678_s0 + $0x1c8] sm:$0xff] }
  0x55   :  { %v294_v18 = vmul.f32 %v3080_v46, %v75_v14 }
  0x56   :  { %v528_v17 = vsel %vm365_vm0, %v291_v11, 0.0 }
  0x57   :  { %v537_v22 = vsel %vm365_vm0, %v294_v18, 0.0  ;;  %v95_v18 = vld [vmem:[%s4678_s0 + $0x268] sm:$0xff] }
  0x58   :  { %478 = vadd.xlane.f32.xlu1 %v477_v19  ;;  %475 = vadd.xlane.f32.xlu0 %v474_v20  ;;  %v293_v19 = vmul.f32 %v3080_v46, %v74_v15  ;;  %v77_v20 = vld [vmem:[%s4678_s0 + $0x1d8] sm:$0xff] }
  0x59   :  { %v296_v24 = vmul.f32 %v3080_v46, %v77_v20  ;;  %v314_v20 = vmul.f32 %v3160_v34, %v95_v18  ;;  %v109_v18 = vld [vmem:[%s4678_s0 + $0x2d8] sm:$0xff] }
  0x5a   :  { %v534_v23 = vsel %vm365_vm0, %v293_v19, 0.0  ;;  %v94_v19 = vld [vmem:[%s4678_s0 + $0x260] sm:$0xff] }
  0x5b   :  { %v543_v28 = vsel %vm365_vm0, %v296_v24, 0.0 }
  0x5c   :  { %484 = vadd.xlane.f32.xlu1 %v483_v25  ;;  %481 = vadd.xlane.f32.xlu0 %v480_v26  ;;  %v295_v25 = vmul.f32 %v3080_v46, %v76_v21  ;;  %v79_v26 = vld [vmem:[%s4678_s0 + $0x1e8] sm:$0xff] }
  0x5d   :  { %v298_v30 = vmul.f32 %v3080_v46, %v79_v26  ;;  %v97_v26 = vld [vmem:[%s4678_s0 + $0x278] sm:$0xff] }
  0x5e   :  { %v540_v29 = vsel %vm365_vm0, %v295_v25, 0.0  ;;  %v313_v25 = vmul.f32 %v3160_v34, %v94_v19  ;;  %v108_v19 = vld [vmem:[%s4678_s0 + $0x2d0] sm:$0xff] }
  0x5f   :  { %v549_v35 = vsel %vm365_vm0, %v298_v30, 0.0 }
  0x60   :  { %490 = vadd.xlane.f32.xlu1 %v489_v31  ;;  %487 = vadd.xlane.f32.xlu0 %v486_v32  ;;  %v297_v31 = vmul.f32 %v3080_v46, %v78_v27  ;;  %v81_v32 = vld [vmem:[%s4678_s0 + $0x1f8] sm:$0xff]  ;;  %v96_v27 = vld [vmem:[%s4678_s0 + $0x270] sm:$0xff] }
  0x61   :  { %v300_v38 = vmul.f32 %v3080_v46, %v81_v32  ;;  %v316_v32 = vmul.f32 %v3160_v34, %v97_v26 }
  0x62   :  { %v546_v36 = vsel %vm365_vm0, %v297_v31, 0.0  ;;  %v594_v31 = vsel %vm365_vm0, %v313_v25, 0.0 }
  0x63   :  { %v555_v41 = vsel %vm365_vm0, %v300_v38, 0.0  ;;  %v98_v38 = vld [vmem:[%s4678_s0 + $0x280] sm:$0xff] }
  0x64   :  { %496 = vadd.xlane.f32.xlu1 %v495_v10  ;;  %493 = vadd.xlane.f32.xlu0 %v492_v39  ;;  %v299_v10 = vmul.f32 %v3080_v46, %v80_v33  ;;  %v83_v39 = vld [vmem:[%s4678_s0 + $0x208] sm:$0xff]  ;;  %v558_v46 = vsel %vm365_vm0, %v301_v51, 0.0  ;;  %v315_v33 = vmul.f32 %v3160_v34, %v96_v27  ;;  %v100_v51 = vld [vmem:[%s4678_s0 + $0x290] sm:$0xff] }
  0x65   :  { %v302_v7 = vmul.f32 %v3160_v34, %v83_v39 }
  0x66   :  { %v552_v42 = vsel %vm365_vm0, %v299_v10, 0.0  ;;  %v600_v40 = vsel %vm365_vm0, %v315_v33, 0.0 }
  0x67   :  { %v561_v45 = vsel %vm365_vm0, %v302_v7, 0.0  ;;  %v101_v7 = vld [vmem:[%s4678_s0 + $0x298] sm:$0xff] }
  0x68   :  { %502 = vadd.xlane.f32.xlu1 %v501_v43  ;;  %499 = vadd.xlane.f32.xlu0 %v498_v44  ;;  %v85_v43 = vld [vmem:[%s4678_s0 + $0x218] sm:$0xff]  ;;  %v84_v44 = vld [vmem:[%s4678_s0 + $0x210] sm:$0xff] }
  0x69   :  { %v304_v47 = vmul.f32 %v3160_v34, %v85_v43  ;;  %v303_v48 = vmul.f32 %v3160_v34, %v84_v44 }
  0x6b   :  { %v567_v52 = vsel %vm365_vm0, %v304_v47, 0.0  ;;  %v564_v12 = vsel %vm365_vm0, %v303_v48, 0.0 }
  0x6c   :  { %508 = vadd.xlane.f32.xlu1 %v507_v49  ;;  %505 = vadd.xlane.f32.xlu0 %v504_v50  ;;  %v87_v49 = vld [vmem:[%s4678_s0 + $0x228] sm:$0xff]  ;;  %v86_v50 = vld [vmem:[%s4678_s0 + $0x220] sm:$0xff] }
  0x6d   :  { %v306_v53 = vmul.f32 %v3160_v34, %v87_v49  ;;  %v305_v54 = vmul.f32 %v3160_v34, %v86_v50  ;;  %v103_v49 = vld [vmem:[%s4678_s0 + $0x2a8] sm:$0xff]  ;;  %v102_v50 = vld [vmem:[%s4678_s0 + $0x2a0] sm:$0xff] }
  0x6f   :  { %v573_v57 = vsel %vm365_vm0, %v306_v53, 0.0  ;;  %v570_v58 = vsel %vm365_vm0, %v305_v54, 0.0 }
  0x70   :  { %514 = vadd.xlane.f32.xlu1 %v513_v55  ;;  %511 = vadd.xlane.f32.xlu0 %v510_v56  ;;  %v89_v55 = vld [vmem:[%s4678_s0 + $0x238] sm:$0xff]  ;;  %v88_v56 = vld [vmem:[%s4678_s0 + $0x230] sm:$0xff] }
  0x71   :  { %v308_v59 = vmul.f32 %v3160_v34, %v89_v55  ;;  %v307_v60 = vmul.f32 %v3160_v34, %v88_v56 }
  0x73   :  { %v579_v63 = vsel %vm365_vm0, %v308_v59, 0.0  ;;  %v576_v1 = vsel %vm365_vm0, %v307_v60, 0.0 }
  0x74   :  { %520 = vadd.xlane.f32.xlu1 %v519_v61  ;;  %517 = vadd.xlane.f32.xlu0 %v516_v62  ;;  %v91_v61 = vld [vmem:[%s4678_s0 + $0x248] sm:$0xff]  ;;  %v90_v62 = vld [vmem:[%s4678_s0 + $0x240] sm:$0xff] }
  0x75   :  { %v310_v2 = vmul.f32 %v3160_v34, %v91_v61  ;;  %v309_v3 = vmul.f32 %v3160_v34, %v90_v62 }
  0x77   :  { %v585_v14 = vsel %vm365_vm0, %v310_v2, 0.0  ;;  %v582_v15 = vsel %vm365_vm0, %v309_v3, 0.0  ;;  %v107_v2 = vld [vmem:[%s4678_s0 + $0x2c8] sm:$0xff]  ;;  %v106_v3 = vld [vmem:[%s4678_s0 + $0x2c0] sm:$0xff] }
  0x78   :  { %526 = vadd.xlane.f32.xlu1 %v525_v5  ;;  %523 = vadd.xlane.f32.xlu0 %v522_v6  ;;  %v93_v5 = vld [vmem:[%s4678_s0 + $0x258] sm:$0xff]  ;;  %v92_v6 = vld [vmem:[%s4678_s0 + $0x250] sm:$0xff] }
  0x7c   :  { %532 = vadd.xlane.f32.xlu1 %v531_v16  ;;  %529 = vadd.xlane.f32.xlu0 %v528_v17  ;;  %v312_v16 = vmul.f32 %v3160_v34, %v93_v5  ;;  %v311_v17 = vmul.f32 %v3160_v34, %v92_v6  ;;  %v603_v34 = vsel %vm365_vm0, %v316_v32, 0.0 }
  0x7e   :  { %v588_v24 = vsel %vm365_vm0, %v311_v17, 0.0 }
  0x80   :  { %538 = vadd.xlane.f32.xlu1 %v537_v22  ;;  %535 = vadd.xlane.f32.xlu0 %v534_v23  ;;  %v591_v23 = vsel %vm365_vm0, %v312_v16, 0.0 }
  0x84   :  { %544 = vadd.xlane.f32.xlu1 %v543_v28  ;;  %541 = vadd.xlane.f32.xlu0 %v540_v29  ;;  %v597_v28 = vsel %vm365_vm0, %v314_v20, 0.0 }
  0x88   :  { %550 = vadd.xlane.f32.xlu1 %v549_v35  ;;  %547 = vadd.xlane.f32.xlu0 %v546_v36  ;;  %v3260_v35 = vrot.slane %v2960_v37, %v2824_v9  ;;  %v99_v36 = vld [vmem:[%s4678_s0 + $0x288] sm:$0xff] }
  0x8a   :  { %v320_v47 = vmul.f32 %v3260_v35, %v101_v7  ;;  %v319_v48 = vmul.f32 %v3260_v35, %v100_v51  ;;  %v322_v55 = vmul.f32 %v3260_v35, %v103_v49  ;;  %v321_v56 = vmul.f32 %v3260_v35, %v102_v50  ;;  %v112_v7 = vld [vmem:[%s4678_s0 + $0x2f0] sm:$0xff]  ;;  %v115_v50 = vld [vmem:[%s4678_s0 + $0x308] sm:$0xff] }
  0x8b   :  { %v326_v16 = vmul.f32 %v3260_v35, %v107_v2  ;;  %v325_v17 = vmul.f32 %v3260_v35, %v106_v3  ;;  %v328_v26 = vmul.f32 %v3260_v35, %v109_v18  ;;  %v327_v27 = vmul.f32 %v3260_v35, %v108_v19 }
  0x8c   :  { %556 = vadd.xlane.f32.xlu1 %v555_v41  ;;  %553 = vadd.xlane.f32.xlu0 %v552_v42  ;;  %v318_v41 = vmul.f32 %v3260_v35, %v99_v36  ;;  %v317_v42 = vmul.f32 %v3260_v35, %v98_v38  ;;  %v615_v53 = vsel %vm365_vm0, %v320_v47, 0.0  ;;  %v612_v54 = vsel %vm365_vm0, %v319_v48, 0.0 }
  0x8d   :  { %v621_v61 = vsel %vm365_vm0, %v322_v55, 0.0  ;;  %v618_v62 = vsel %vm365_vm0, %v321_v56, 0.0  ;;  %v630_v25 = vsel %vm365_vm0, %v325_v17, 0.0  ;;  %v639_v38 = vsel %vm365_vm0, %v328_v26, 0.0  ;;  %v118_v17 = vld [vmem:[%s4678_s0 + $0x320] sm:$0xff] }
  0x8e   :  { %v331_v48 = vmul.f32 %v3260_v35, %v112_v7  ;;  %v123_v7 = vld [vmem:[%s4678_s0 + $0x348] sm:$0xff] }
  0x90   :  { %562 = vadd.xlane.f32.xlu1 %v561_v45  ;;  %559 = vadd.xlane.f32.xlu0 %v558_v46  ;;  %v609_v45 = vsel %vm365_vm0, %v318_v41, 0.0  ;;  %v606_v46 = vsel %vm365_vm0, %v317_v42, 0.0  ;;  %v194_v41 = vcombine.high %v2837_v13, %v2837_v13  ;;  %v113_v42 = vld [vmem:[%s4678_s0 + $0x2f8] sm:$0xff] }
  0x91   :  { %v332_v13 = vmul.f32 %v3260_v35, %v113_v42 }
  0x92   :  { %v3377_v49 = vrot.slane %v194_v41, %v2824_v9 }
  0x93   :  { %v651_v56 = vsel %vm365_vm0, %v332_v13, 0.0 }
  0x94   :  { %568 = vadd.xlane.f32.xlu1 %v567_v52  ;;  %565 = vadd.xlane.f32.xlu0 %v564_v12 }
  0x98   :  { %574 = vadd.xlane.f32.xlu1 %v573_v57  ;;  %571 = vadd.xlane.f32.xlu0 %v570_v58  ;;  %v105_v57 = vld [vmem:[%s4678_s0 + $0x2b8] sm:$0xff]  ;;  %v104_v58 = vld [vmem:[%s4678_s0 + $0x2b0] sm:$0xff] }
  0x9c   :  { %580 = vadd.xlane.f32.xlu1 %v579_v63  ;;  %577 = vadd.xlane.f32.xlu0 %v576_v1  ;;  %v324_v63 = vmul.f32 %v3260_v35, %v105_v57  ;;  %v323_v1 = vmul.f32 %v3260_v35, %v104_v58  ;;  %v334_v57 = vmul.f32 %v3377_v49, %v115_v50 }
  0x9d   :  { %v3222_v8 = vpop.xlane.xlu1 %373  ;;  %v3224_v11 = vpop.xlane.xlu0 %367 }
  0x9e   :  { %v657_v2 = vsel %vm365_vm0, %v334_v57, 0.0  ;;  %v124_v57 = vld [vmem:[%s4678_s0 + $0x350] sm:$0xff] }
  0xa0   :  { %586 = vadd.xlane.f32.xlu1 %v585_v14  ;;  %583 = vadd.xlane.f32.xlu0 %v582_v15  ;;  %v627_v14 = vsel %vm365_vm0, %v324_v63, 0.0  ;;  %v624_v15 = vsel %vm365_vm0, %v323_v1, 0.0 }
  0xa1   :  { %v3237_v21 = vpop.xlane.xlu1 %376  ;;  %v3239_v22 = vpop.xlane.xlu0 %370 }
  0xa4   :  { %592 = vadd.xlane.f32.xlu1 %v591_v23  ;;  %589 = vadd.xlane.f32.xlu0 %v588_v24  ;;  %v633_v24 = vsel %vm365_vm0, %v326_v16, 0.0  ;;  %v119_v16 = vld [vmem:[%s4678_s0 + $0x328] sm:$0xff] }
  0xa5   :  { %v3251_v29 = vpop.xlane.xlu1 %382  ;;  %v3253_v30 = vpop.xlane.xlu0 %379  ;;  %v338_v26 = vmul.f32 %v3377_v49, %v119_v16  ;;  %v126_v16 = vld [vmem:[%s4678_s0 + $0x360] sm:$0xff] }
  0xa8   :  { %598 = vadd.xlane.f32.xlu1 %v597_v28  ;;  %595 = vadd.xlane.f32.xlu0 %v594_v31  ;;  %v111_v28 = vld [vmem:[%s4678_s0 + $0x2e8] sm:$0xff]  ;;  %v110_v31 = vld [vmem:[%s4678_s0 + $0x2e0] sm:$0xff] }
  0xa9   :  { %v3268_v10 = vpop.xlane.xlu1 %388  ;;  %v3270_v39 = vpop.xlane.xlu0 %385  ;;  %v330_v32 = vmul.f32 %v3260_v35, %v111_v28  ;;  %v121_v28 = vld [vmem:[%s4678_s0 + $0x338] sm:$0xff] }
  0xaa   :  { %v340_v41 = vmul.f32 %v3377_v49, %v121_v28  ;;  %v345_v28 = vmul.f32 %v3377_v49, %v126_v16 }
  0xab   :  { %v645_v51 = vsel %vm365_vm0, %v330_v32, 0.0 }
  0xac   :  { %604 = vadd.xlane.f32.xlu1 %v603_v34  ;;  %601 = vadd.xlane.f32.xlu0 %v600_v40  ;;  %v636_v34 = vsel %vm365_vm0, %v327_v27, 0.0  ;;  %v329_v40 = vmul.f32 %v3260_v35, %v110_v31  ;;  %v648_v35 = vsel %vm365_vm0, %v331_v48, 0.0  ;;  %v337_v27 = vmul.f32 %v3377_v49, %v118_v17  ;;  %v120_v31 = vld [vmem:[%s4678_s0 + $0x330] sm:$0xff] }
  0xad   :  { %v3282_v43 = vpop.xlane.xlu1 %394  ;;  %v3284_v44 = vpop.xlane.xlu0 %391  ;;  %v339_v42 = vmul.f32 %v3377_v49, %v120_v31  ;;  %v675_v48 = vsel %vm365_vm0, %v340_v41, 0.0  ;;  %v196_v31 = vcombine.high %v2960_v37, %v2960_v37 }
  0xae   :  { %v642_v47 = vsel %vm365_vm0, %v329_v40, 0.0  ;;  %v666_v40 = vsel %vm365_vm0, %v337_v27, 0.0 }
  0xaf   :  { %v672_v50 = vsel %vm365_vm0, %v339_v42, 0.0 }
  0xb0   :  { %610 = vadd.xlane.f32.xlu1 %v609_v45  ;;  %607 = vadd.xlane.f32.xlu0 %v606_v46 }
  0xb1   :  { %v3296_v52 = vpop.xlane.xlu1 %400  ;;  %v3298_v12 = vpop.xlane.xlu0 %397 }
  0xb4   :  { %616 = vadd.xlane.f32.xlu1 %v615_v53  ;;  %613 = vadd.xlane.f32.xlu0 %v612_v54  ;;  %v114_v53 = vld [vmem:[%s4678_s0 + $0x300] sm:$0xff] }
  0xb5   :  { %v3310_v59 = vpop.xlane.xlu1 %406  ;;  %v3312_v60 = vpop.xlane.xlu0 %403  ;;  %v333_v58 = vmul.f32 %v3377_v49, %v114_v53  ;;  %v342_v53 = vmul.f32 %v3377_v49, %v123_v7 }
  0xb7   :  { %v654_v3 = vsel %vm365_vm0, %v333_v58, 0.0 }
  0xb8   :  { %622 = vadd.xlane.f32.xlu1 %v621_v61  ;;  %619 = vadd.xlane.f32.xlu0 %v618_v62  ;;  %v117_v61 = vld [vmem:[%s4678_s0 + $0x318] sm:$0xff]  ;;  %v116_v62 = vld [vmem:[%s4678_s0 + $0x310] sm:$0xff] }
  0xb9   :  { %v3324_v5 = vpop.xlane.xlu1 %412  ;;  %v3326_v6 = vpop.xlane.xlu0 %409 }
  0xbc   :  { %628 = vadd.xlane.f32.xlu1 %v627_v14  ;;  %625 = vadd.xlane.f32.xlu0 %v624_v15  ;;  %v336_v14 = vmul.f32 %v3377_v49, %v117_v61  ;;  %v335_v15 = vmul.f32 %v3377_v49, %v116_v62  ;;  %v681_v62 = vsel %vm365_vm0, %v342_v53, 0.0  ;;  %v131_v53 = vld [vmem:[%s4678_s0 + $0x388] sm:$0xff] }
  0xbd   :  { %v3338_v20 = vpop.xlane.xlu1 %418  ;;  %v3340_v23 = vpop.xlane.xlu0 %415 }
  0xc0   :  { %634 = vadd.xlane.f32.xlu1 %v633_v24  ;;  %631 = vadd.xlane.f32.xlu0 %v630_v25  ;;  %v663_v24 = vsel %vm365_vm0, %v336_v14, 0.0  ;;  %v660_v25 = vsel %vm365_vm0, %v335_v15, 0.0  ;;  %v343_v14 = vmul.f32 %v3377_v49, %v124_v57  ;;  %v127_v15 = vld [vmem:[%s4678_s0 + $0x368] sm:$0xff] }
  0xc1   :  { %v3353_v33 = vpop.xlane.xlu1 %424  ;;  %v3355_v36 = vpop.xlane.xlu0 %421  ;;  %v346_v17 = vmul.f32 %v3377_v49, %v127_v15  ;;  %v132_v15 = vld [vmem:[%s4678_s0 + $0x390] sm:$0xff] }
  0xc2   :  { %v684_v27 = vsel %vm365_vm0, %v343_v14, 0.0  ;;  %v133_v14 = vld [vmem:[%s4678_s0 + $0x398] sm:$0xff] }
  0xc3   :  { %v693_v41 = vsel %vm365_vm0, %v346_v17, 0.0 }
  0xc4   :  { %640 = vadd.xlane.f32.xlu1 %v639_v38  ;;  %637 = vadd.xlane.f32.xlu0 %v636_v34  ;;  %v669_v34 = vsel %vm365_vm0, %v338_v26, 0.0 }
  0xc5   :  { %v3369_v45 = vpop.xlane.xlu1 %430  ;;  %v3371_v46 = vpop.xlane.xlu0 %427 }
  0xc8   :  { %646 = vadd.xlane.f32.xlu1 %v645_v51  ;;  %643 = vadd.xlane.f32.xlu0 %v642_v47  ;;  %v122_v51 = vld [vmem:[%s4678_s0 + $0x340] sm:$0xff] }
  0xc9   :  { %v3385_v54 = vpop.xlane.xlu1 %436  ;;  %v3387_v55 = vpop.xlane.xlu0 %433 }
  0xcc   :  { %652 = vadd.xlane.f32.xlu1 %v651_v56  ;;  %649 = vadd.xlane.f32.xlu0 %v648_v35  ;;  %v341_v56 = vmul.f32 %v3377_v49, %v122_v51  ;;  %v125_v35 = vld [vmem:[%s4678_s0 + $0x358] sm:$0xff]  ;;  %v690_v51 = vsel %vm365_vm0, %v345_v28, 0.0 }
  0xcd   :  { %v3399_v63 = vpop.xlane.xlu1 %442  ;;  %v3401_v1 = vpop.xlane.xlu0 %439 }
  0xd0   :  { %658 = vadd.xlane.f32.xlu1 %v657_v2  ;;  %655 = vadd.xlane.f32.xlu0 %v654_v3  ;;  %v678_v2 = vsel %vm365_vm0, %v341_v56, 0.0  ;;  %v344_v3 = vmul.f32 %v3377_v49, %v125_v35  ;;  %v130_v56 = vld [vmem:[%s4678_s0 + $0x380] sm:$0xff] }
  0xd1   :  { %v3413_v18 = vpop.xlane.xlu1 %448  ;;  %v3415_v19 = vpop.xlane.xlu0 %445 }
  0xd2   :  { %4688 = vst [vmem:[#allocation6_spill] sm:$0xff] %v3413_v18  ;;  %4689 = vst [vmem:[#allocation7_spill] sm:$0xff] %v3415_v19  ;;  %v687_v26 = vsel %vm365_vm0, %v344_v3, 0.0 }
  0xd4   :  { %664 = vadd.xlane.f32.xlu1 %v663_v24  ;;  %661 = vadd.xlane.f32.xlu0 %v660_v25 }
  0xd5   :  { %v3427_v32 = vpop.xlane.xlu1 %454  ;;  %v3429_v38 = vpop.xlane.xlu0 %451 }
  0xd6   :  { %4690 = vst [vmem:[#allocation8_spill] sm:$0xff] %v3427_v32  ;;  %4691 = vst [vmem:[#allocation9_spill] sm:$0xff] %v3429_v38 }
  0xd8   :  { %670 = vadd.xlane.f32.xlu1 %v669_v34  ;;  %667 = vadd.xlane.f32.xlu0 %v666_v40  ;;  %v129_v34 = vld [vmem:[%s4678_s0 + $0x378] sm:$0xff]  ;;  %v128_v40 = vld [vmem:[%s4678_s0 + $0x370] sm:$0xff] }
  0xd9   :  { %v3441_v47 = vpop.xlane.xlu1 %460  ;;  %v3443_v13 = vpop.xlane.xlu0 %457  ;;  %v348_v37 = vmul.f32 %v3377_v49, %v129_v34  ;;  %v135_v34 = vld [vmem:[%s4678_s0 + $0x3a8] sm:$0xff] }
  0xda   :  { %4692 = vst [vmem:[#allocation10_spill] sm:$0xff] %v3441_v47  ;;  %4693 = vst [vmem:[#allocation11_spill] sm:$0xff] %v3443_v13  ;;  %v1156_v47 = vsub.s32 6, %v2817_v4 }
  0xdc   :  { %676 = vadd.xlane.f32.xlu1 %v675_v48  ;;  %673 = vadd.xlane.f32.xlu0 %v672_v50  ;;  %v347_v48 = vmul.f32 %v3377_v49, %v128_v40  ;;  %v3494_v50 = vrot.slane %v196_v31, %v2824_v9  ;;  %v134_v40 = vld [vmem:[%s4678_s0 + $0x3a0] sm:$0xff] }
  0xdd   :  { %v3455_v58 = vpop.xlane.xlu1 %466  ;;  %v3457_v61 = vpop.xlane.xlu0 %463 }
  0xde   :  { %4694 = vst [vmem:[#allocation12_spill] sm:$0xff] %v3455_v58  ;;  %4695 = vst [vmem:[#allocation13_spill] sm:$0xff] %v3457_v61  ;;  %v696_v49 = vsel %vm365_vm0, %v347_v48, 0.0  ;;  %v349_v3 = vmul.f32 %v3494_v50, %v130_v56  ;;  %v352_v28 = vmul.f32 %v3494_v50, %v133_v14  ;;  %v351_v31 = vmul.f32 %v3494_v50, %v132_v15 }
  0xdf   :  { %v353_v56 = vmul.f32 %v3494_v50, %v134_v40 }
  0xe0   :  { %682 = vadd.xlane.f32.xlu1 %v681_v62  ;;  %679 = vadd.xlane.f32.xlu0 %v678_v2  ;;  %v699_v62 = vsel %vm365_vm0, %v348_v37, 0.0  ;;  %v350_v2 = vmul.f32 %v3494_v50, %v131_v53  ;;  %v711_v37 = vsel %vm365_vm0, %v352_v28, 0.0  ;;  %v708_v48 = vsel %vm365_vm0, %v351_v31, 0.0  ;;  %v139_v28 = vld [vmem:[%s4678_s0 + $0x3c8] sm:$0xff]  ;;  %v138_v31 = vld [vmem:[%s4678_s0 + $0x3c0] sm:$0xff] }
  0xe1   :  { %v3470_v24 = vpop.xlane.xlu1 %472  ;;  %v3472_v25 = vpop.xlane.xlu0 %469  ;;  %v354_v53 = vmul.f32 %v3494_v50, %v135_v34  ;;  %v714_v15 = vsel %vm365_vm0, %v353_v56, 0.0  ;;  %v357_v56 = vmul.f32 %v3494_v50, %v138_v31 }
  0xe2   :  { %4696 = vst [vmem:[#allocation14_spill] sm:$0xff] %v3470_v24  ;;  %4697 = vst [vmem:[#allocation15_spill] sm:$0xff] %v3472_v25 }
  0xe3   :  { %v717_v14 = vsel %vm365_vm0, %v354_v53, 0.0  ;;  %v358_v53 = vmul.f32 %v3494_v50, %v139_v28 }
  0xe4   :  { %688 = vadd.xlane.f32.xlu1 %v687_v26  ;;  %685 = vadd.xlane.f32.xlu0 %v684_v27  ;;  %v705_v26 = vsel %vm365_vm0, %v350_v2, 0.0  ;;  %v702_v27 = vsel %vm365_vm0, %v349_v3, 0.0 }
  0xe5   :  { %v3486_v42 = vpop.xlane.xlu1 %478  ;;  %v3488_v7 = vpop.xlane.xlu0 %475 }
  0xe6   :  { %4698 = vst [vmem:[#allocation16_spill] sm:$0xff] %v3486_v42  ;;  %4699 = vst [vmem:[#allocation17_spill] sm:$0xff] %v3488_v7 }
  0xe8   :  { %694 = vadd.xlane.f32.xlu1 %v693_v41  ;;  %691 = vadd.xlane.f32.xlu0 %v690_v51 }
  0xe9   :  { %v3502_v35 = vpop.xlane.xlu1 %484  ;;  %v3504_v57 = vpop.xlane.xlu0 %481 }
  0xea   :  { %4700 = vst [vmem:[#allocation18_spill] sm:$0xff] %v3502_v35  ;;  %4701 = vst [vmem:[#allocation19_spill] sm:$0xff] %v3504_v57 }
  0xec   :  { %700 = vadd.xlane.f32.xlu1 %v699_v62  ;;  %697 = vadd.xlane.f32.xlu0 %v696_v49  ;;  %v137_v62 = vld [vmem:[%s4678_s0 + $0x3b8] sm:$0xff]  ;;  %v136_v49 = vld [vmem:[%s4678_s0 + $0x3b0] sm:$0xff] }
  0xed   :  { %v3516_v16 = vpop.xlane.xlu1 %490  ;;  %v3518_v17 = vpop.xlane.xlu0 %487 }
  0xee   :  { %4702 = vst [vmem:[#allocation20_spill] sm:$0xff] %v3516_v16  ;;  %4703 = vst [vmem:[#allocation21_spill] sm:$0xff] %v3518_v17 }
  0xf0   :  { %706 = vadd.xlane.f32.xlu1 %v705_v26  ;;  %703 = vadd.xlane.f32.xlu0 %v702_v27  ;;  %v356_v26 = vmul.f32 %v3494_v50, %v137_v62  ;;  %v355_v27 = vmul.f32 %v3494_v50, %v136_v49  ;;  %v141_v62 = vld [vmem:[%s4678_s0 + $0x3d8] sm:$0xff]  ;;  %v140_v49 = vld [vmem:[%s4678_s0 + $0x3d0] sm:$0xff] }
  0xf1   :  { %v3530_v41 = vpop.xlane.xlu1 %496  ;;  %v3532_v51 = vpop.xlane.xlu0 %493  ;;  %v360_v28 = vmul.f32 %v3494_v50, %v141_v62  ;;  %v359_v31 = vmul.f32 %v3494_v50, %v140_v49  ;;  %v362_v62 = vmul.f32 %v3494_v50, %v143_v0 }
  0xf2   :  { %4704 = vst [vmem:[#allocation22_spill] sm:$0xff] %v3530_v41  ;;  %4705 = vst [vmem:[#allocation23_spill] sm:$0xff] %v3532_v51 }
  0xf4   :  { %712 = vadd.xlane.f32.xlu1 %v711_v37  ;;  %709 = vadd.xlane.f32.xlu0 %v708_v48  ;;  %v723_v37 = vsel %vm365_vm0, %v356_v26, 0.0  ;;  %v720_v48 = vsel %vm365_vm0, %v355_v27, 0.0  ;;  %v729_v26 = vsel %vm365_vm0, %v358_v53, 0.0  ;;  %v726_v27 = vsel %vm365_vm0, %v357_v56, 0.0 }
  0xf5   :  { %v3544_v2 = vpop.xlane.xlu1 %502  ;;  %v3546_v3 = vpop.xlane.xlu0 %499  ;;  %v735_v53 = vsel %vm365_vm0, %v360_v28, 0.0  ;;  %v732_v56 = vsel %vm365_vm0, %v359_v31, 0.0  ;;  %v741_v28 = vsel %vm365_vm0, %v362_v62, 0.0 }
  0xf6   :  { %4706 = vst [vmem:[#allocation24_spill] sm:$0xff] %v3544_v2  ;;  %4707 = vst [vmem:[#allocation25_spill] sm:$0xff] %v3546_v3 }
  0xf8   :  { %718 = vadd.xlane.f32.xlu1 %v717_v14  ;;  %715 = vadd.xlane.f32.xlu0 %v714_v15 }
  0xf9   :  { %v3558_v34 = vpop.xlane.xlu1 %508  ;;  %v3560_v40 = vpop.xlane.xlu0 %505 }
  0xfa   :  { %4708 = vst [vmem:[#allocation26_spill] sm:$0xff] %v3558_v34  ;;  %4709 = vst [vmem:[#allocation27_spill] sm:$0xff] %v3560_v40  ;;  %v1089_v34 = vsub.s32 5, %v2817_v4 }
  0xfc   :  { %724 = vadd.xlane.f32.xlu1 %v723_v37  ;;  %721 = vadd.xlane.f32.xlu0 %v720_v48  ;;  %v142_v37 = vld [vmem:[%s4678_s0 + $0x3e0] sm:$0xff] }
  0xfd   :  { %v3572_v14 = vpop.xlane.xlu1 %514  ;;  %v3574_v15 = vpop.xlane.xlu0 %511  ;;  %v361_v49 = vmul.f32 %v3494_v50, %v142_v37 }
  0xfe   :  { %4710 = vst [vmem:[#allocation28_spill] sm:$0xff] %v3572_v14  ;;  %4711 = vst [vmem:[#allocation29_spill] sm:$0xff] %v3574_v15  ;;  %v145_v14 = vld [vmem:[%s4678_s0 + $0x3f8] sm:$0xff] }
  0xff   :  { %v738_v0 = vsel %vm365_vm0, %v361_v49, 0.0  ;;  %v364_v31 = vmul.f32 %v3494_v50, %v145_v14 }
 0x100   :  { %730 = vadd.xlane.f32.xlu1 %v729_v26  ;;  %727 = vadd.xlane.f32.xlu0 %v726_v27  ;;  %v144_v26 = vld [vmem:[%s4678_s0 + $0x3f0] sm:$0xff] }
 0x101   :  { %v3586_v48 = vpop.xlane.xlu1 %520  ;;  %v3588_v15 = vpop.xlane.xlu0 %517  ;;  %v363_v37 = vmul.f32 %v3494_v50, %v144_v26 }
 0x102   :  { %4712 = vst [vmem:[#allocation30_spill] sm:$0xff] %v3586_v48  ;;  %4713 = vst [vmem:[#allocation31_spill] sm:$0xff] %v3588_v15 }
 0x104   :  { %736 = vadd.xlane.f32.xlu1 %v735_v53  ;;  %733 = vadd.xlane.f32.xlu0 %v732_v56  ;;  %v747_v53 = vsel %vm365_vm0, %v364_v31, 0.0  ;;  %v744_v56 = vsel %vm365_vm0, %v363_v37, 0.0  ;;  %vm2721_vm0 = vcmask 1041409  }
 0x105   :  { %v3600_v27 = vpop.xlane.xlu1 %526  ;;  %v3602_v15 = vpop.xlane.xlu0 %523 }
 0x106   :  { %4714 = vst [vmem:[#allocation32_spill] sm:$0xff] %v3600_v27  ;;  %4715 = vst [vmem:[#allocation33_spill] sm:$0xff] %v3602_v15 }
 0x108   :  { %742 = vadd.xlane.f32.xlu1 %v741_v28  ;;  %739 = vadd.xlane.f32.xlu0 %v738_v0  ;;  %v3629_v28 = vld [vmem:[%s4680_s2] sm:$0xff] }
 0x109   :  { %v3608_v48 = vpop.xlane.xlu1 %532  ;;  %v3610_v40 = vpop.xlane.xlu0 %529  ;;  %v755_v37 = vrot.slane %v3629_v28, %v2824_v9  ;;  %v1090_v51 = vrot.slane %v3629_v28, %v1089_v34 }
 0x10a   :  { %4716 = vst [vmem:[#allocation34_spill] sm:$0xff] %v3608_v48  ;;  %4717 = vst [vmem:[#allocation35_spill] sm:$0xff] %v3610_v40 }
 0x10c   :  { %748 = vadd.xlane.f32.xlu1 %v747_v53  ;;  %745 = vadd.xlane.f32.xlu0 %v744_v56 }
 0x10d   :  { %v3614_v15 = vpop.xlane.xlu1 %538  ;;  %v3616_v62 = vpop.xlane.xlu0 %535 }
 0x10e   :  { %4718 = vst [vmem:[#allocation36_spill] sm:$0xff] %v3614_v15  ;;  %4719 = vst [vmem:[#allocation37_spill] sm:$0xff] %v3616_v62 }
 0x111   :  { %v3618_v49 = vpop.xlane.xlu1 %544  ;;  %v3620_v14 = vpop.xlane.xlu0 %541 }
 0x112   :  { %4720 = vst [vmem:[#allocation38_spill] sm:$0xff] %v3618_v49  ;;  %4721 = vst [vmem:[#allocation39_spill] sm:$0xff] %v3620_v14 }
 0x115   :  { %v3622_v50 = vpop.xlane.xlu1 %550  ;;  %v3624_v26 = vpop.xlane.xlu0 %547 }
 0x116   :  { %4722 = vst [vmem:[#allocation40_spill] sm:$0xff] %v3622_v50  ;;  %4723 = vst [vmem:[#allocation41_spill] sm:$0xff] %v3624_v26 }
 0x119   :  { %v3631_v0 = vpop.xlane.xlu1 %556  ;;  %v3633_v31 = vpop.xlane.xlu0 %553 }
 0x11a   :  { %4724 = vst [vmem:[#allocation42_spill] sm:$0xff] %v3631_v0  ;;  %4725 = vst [vmem:[#allocation43_spill] sm:$0xff] %v3633_v31 }
 0x11d   :  { %761 = vbcast.lane.b32.xlu1 %v755_v37, 264  ;;  %v3637_v53 = vpop.xlane.xlu1 %562  ;;  %v3639_v56 = vpop.xlane.xlu0 %559 }
 0x11e   :  { %4726 = vst [vmem:[#allocation44_spill] sm:$0xff] %v3637_v53  ;;  %4727 = vst [vmem:[#allocation45_spill] sm:$0xff] %v3639_v56 }
 0x121   :  { %765 = vbcast.lane.b32.xlu1 %v755_v37, 272  ;;  %v3641_v50 = vpop.xlane.xlu1 %568  ;;  %v3643_v26 = vpop.xlane.xlu0 %565 }
 0x122   :  { %4728 = vst [vmem:[#allocation46_spill] sm:$0xff] %v3641_v50  ;;  %4729 = vst [vmem:[#allocation47_spill] sm:$0xff] %v3643_v26  ;;  %757 = vbcast.lane.b32.xlu0 %v755_v37, 256 }
 0x125   :  { %769 = vbcast.lane.b32.xlu1 %v755_v37, 280  ;;  %v3645_v14 = vpop.xlane.xlu1 %574  ;;  %v3647_v0 = vpop.xlane.xlu0 %571 }
 0x126   :  { %4730 = vst [vmem:[#allocation48_spill] sm:$0xff] %v3645_v14  ;;  %4731 = vst [vmem:[#allocation49_spill] sm:$0xff] %v3647_v0  ;;  %773 = vbcast.lane.b32.xlu0 %v755_v37, 288 }
 0x129   :  { %777 = vbcast.lane.b32.xlu1 %v755_v37, 296  ;;  %v3649_v31 = vpop.xlane.xlu1 %580  ;;  %v3651_v9 = vpop.xlane.xlu0 %577 }
 0x12a   :  { %4732 = vst [vmem:[#allocation50_spill] sm:$0xff] %v3649_v31  ;;  %4733 = vst [vmem:[#allocation51_spill] sm:$0xff] %v3651_v9  ;;  %781 = vbcast.lane.b32.xlu0 %v755_v37, 304  ;;  %v821_v9 = vsub.s32 1, %v2817_v4 }
 0x12d   :  { %785 = vbcast.lane.b32.xlu1 %v755_v37, 312  ;;  %v3653_v56 = vpop.xlane.xlu1 %586  ;;  %v3655_v53 = vpop.xlane.xlu0 %583 }
 0x12e   :  { %4734 = vst [vmem:[#allocation52_spill] sm:$0xff] %v3653_v56  ;;  %4735 = vst [vmem:[#allocation53_spill] sm:$0xff] %v3655_v53  ;;  %789 = vbcast.lane.b32.xlu0 %v755_v37, 320  ;;  %v822_v53 = vrot.slane %v3629_v28, %v821_v9 }
 0x131   :  { %793 = vbcast.lane.b32.xlu1 %v755_v37, 328  ;;  %v3657_v26 = vpop.xlane.xlu1 %592  ;;  %v3659_v50 = vpop.xlane.xlu0 %589 }
 0x132   :  { %4736 = vst [vmem:[#allocation54_spill] sm:$0xff] %v3657_v26  ;;  %4737 = vst [vmem:[#allocation55_spill] sm:$0xff] %v3659_v50  ;;  %797 = vbcast.lane.b32.xlu0 %v755_v37, 336 }
 0x135   :  { %801 = vbcast.lane.b32.xlu1 %v755_v37, 344  ;;  %v3661_v0 = vpop.xlane.xlu1 %598  ;;  %v3663_v14 = vpop.xlane.xlu0 %595 }
 0x136   :  { %4738 = vst [vmem:[#allocation56_spill] sm:$0xff] %v3661_v0  ;;  %4739 = vst [vmem:[#allocation57_spill] sm:$0xff] %v3663_v14  ;;  %805 = vbcast.lane.b32.xlu0 %v755_v37, 352 }
 0x139   :  { %809 = vbcast.lane.b32.xlu1 %v755_v37, 360  ;;  %v3666_v31 = vpop.xlane.xlu1 %604  ;;  %v3668_v56 = vpop.xlane.xlu0 %601 }
 0x13a   :  { %4740 = vst [vmem:[#allocation58_spill] sm:$0xff] %v3666_v31  ;;  %4741 = vst [vmem:[#allocation59_spill] sm:$0xff] %v3668_v56  ;;  %813 = vbcast.lane.b32.xlu0 %v755_v37, 368 }
 0x13d   :  { %817 = vbcast.lane.b32.xlu1 %v755_v37, 376  ;;  %v3671_v26 = vpop.xlane.xlu1 %610  ;;  %v3673_v50 = vpop.xlane.xlu0 %607 }
 0x13e   :  { %4742 = vst [vmem:[#allocation60_spill] sm:$0xff] %v3671_v26  ;;  %4743 = vst [vmem:[#allocation61_spill] sm:$0xff] %v3673_v50  ;;  %824 = vbcast.lane.b32.xlu0 %v822_v53, 256 }
 0x141   :  { %828 = vbcast.lane.b32.xlu1 %v822_v53, 264  ;;  %v3675_v0 = vpop.xlane.xlu1 %616  ;;  %v3677_v14 = vpop.xlane.xlu0 %613 }
 0x142   :  { %4744 = vst [vmem:[#allocation62_spill] sm:$0xff] %v3675_v0  ;;  %4745 = vst [vmem:[#allocation63_spill] sm:$0xff] %v3677_v14  ;;  %832 = vbcast.lane.b32.xlu0 %v822_v53, 272 }
 0x145   :  { %836 = vbcast.lane.b32.xlu1 %v822_v53, 280  ;;  %v3679_v49 = vpop.xlane.xlu1 %622  ;;  %v3681_v31 = vpop.xlane.xlu0 %619 }
 0x146   :  { %4746 = vst [vmem:[#allocation64_spill] sm:$0xff] %v3679_v49  ;;  %4747 = vst [vmem:[#allocation65_spill] sm:$0xff] %v3681_v31  ;;  %840 = vbcast.lane.b32.xlu0 %v822_v53, 288 }
 0x149   :  { %844 = vbcast.lane.b32.xlu1 %v822_v53, 296  ;;  %v3683_v9 = vpop.xlane.xlu1 %628  ;;  %v3685_v37 = vpop.xlane.xlu0 %625 }
 0x14a   :  { %4748 = vst [vmem:[#allocation66_spill] sm:$0xff] %v3683_v9  ;;  %4749 = vst [vmem:[#allocation67_spill] sm:$0xff] %v3685_v37  ;;  %848 = vbcast.lane.b32.xlu0 %v822_v53, 304  ;;  %v888_v37 = vsub.s32 2, %v2817_v4 }
 0x14d   :  { %852 = vbcast.lane.b32.xlu1 %v822_v53, 312  ;;  %v3687_v50 = vpop.xlane.xlu1 %634  ;;  %v3689_v26 = vpop.xlane.xlu0 %631 }
 0x14e   :  { %4750 = vst [vmem:[#allocation68_spill] sm:$0xff] %v3687_v50  ;;  %4751 = vst [vmem:[#allocation69_spill] sm:$0xff] %v3689_v26  ;;  %856 = vbcast.lane.b32.xlu0 %v822_v53, 320  ;;  %v889_v26 = vrot.slane %v3629_v28, %v888_v37 }
 0x151   :  { %860 = vbcast.lane.b32.xlu1 %v822_v53, 328  ;;  %v3691_v14 = vpop.xlane.xlu1 %640  ;;  %v3693_v0 = vpop.xlane.xlu0 %637 }
 0x152   :  { %4752 = vst [vmem:[#allocation70_spill] sm:$0xff] %v3691_v14  ;;  %4753 = vst [vmem:[#allocation71_spill] sm:$0xff] %v3693_v0  ;;  %864 = vbcast.lane.b32.xlu0 %v822_v53, 336 }
 0x155   :  { %868 = vbcast.lane.b32.xlu1 %v822_v53, 344  ;;  %v3695_v31 = vpop.xlane.xlu1 %646  ;;  %v3697_v49 = vpop.xlane.xlu0 %643 }
 0x156   :  { %4754 = vst [vmem:[#allocation72_spill] sm:$0xff] %v3695_v31  ;;  %4755 = vst [vmem:[#allocation73_spill] sm:$0xff] %v3697_v49  ;;  %872 = vbcast.lane.b32.xlu0 %v822_v53, 352 }
 0x159   :  { %876 = vbcast.lane.b32.xlu1 %v822_v53, 360  ;;  %v3700_v9 = vpop.xlane.xlu1 %652  ;;  %v3702_v50 = vpop.xlane.xlu0 %649 }
 0x15a   :  { %4756 = vst [vmem:[#allocation74_spill] sm:$0xff] %v3700_v9  ;;  %4757 = vst [vmem:[#allocation75_spill] sm:$0xff] %v3702_v50  ;;  %880 = vbcast.lane.b32.xlu0 %v822_v53, 368 }
 0x15d   :  { %884 = vbcast.lane.b32.xlu1 %v822_v53, 376  ;;  %v3705_v14 = vpop.xlane.xlu1 %658  ;;  %v3707_v0 = vpop.xlane.xlu0 %655 }
 0x15e   :  { %4758 = vst [vmem:[#allocation76_spill] sm:$0xff] %v3705_v14  ;;  %4759 = vst [vmem:[#allocation77_spill] sm:$0xff] %v3707_v0  ;;  %891 = vbcast.lane.b32.xlu0 %v889_v26, 256 }
 0x161   :  { %895 = vbcast.lane.b32.xlu1 %v889_v26, 264  ;;  %v3709_v31 = vpop.xlane.xlu1 %664  ;;  %v3711_v49 = vpop.xlane.xlu0 %661 }
 0x162   :  { %4760 = vst [vmem:[#allocation78_spill] sm:$0xff] %v3709_v31  ;;  %4761 = vst [vmem:[#allocation79_spill] sm:$0xff] %v3711_v49  ;;  %899 = vbcast.lane.b32.xlu0 %v889_v26, 272 }
 0x165   :  { %903 = vbcast.lane.b32.xlu1 %v889_v26, 280  ;;  %v3713_v56 = vpop.xlane.xlu1 %670  ;;  %v3715_v9 = vpop.xlane.xlu0 %667 }
 0x166   :  { %4762 = vst [vmem:[#allocation80_spill] sm:$0xff] %v3713_v56  ;;  %4763 = vst [vmem:[#allocation81_spill] sm:$0xff] %v3715_v9  ;;  %907 = vbcast.lane.b32.xlu0 %v889_v26, 288 }
 0x169   :  { %911 = vbcast.lane.b32.xlu1 %v889_v26, 296  ;;  %v3717_v37 = vpop.xlane.xlu1 %676  ;;  %v3719_v53 = vpop.xlane.xlu0 %673 }
 0x16a   :  { %4764 = vst [vmem:[#allocation82_spill] sm:$0xff] %v3717_v37  ;;  %4765 = vst [vmem:[#allocation83_spill] sm:$0xff] %v3719_v53  ;;  %915 = vbcast.lane.b32.xlu0 %v889_v26, 304  ;;  %v955_v53 = vsub.s32 3, %v2817_v4 }
 0x16d   :  { %919 = vbcast.lane.b32.xlu1 %v889_v26, 312  ;;  %v3721_v0 = vpop.xlane.xlu1 %682  ;;  %v3723_v14 = vpop.xlane.xlu0 %679 }
 0x16e   :  { %4766 = vst [vmem:[#allocation84_spill] sm:$0xff] %v3721_v0  ;;  %4767 = vst [vmem:[#allocation85_spill] sm:$0xff] %v3723_v14  ;;  %923 = vbcast.lane.b32.xlu0 %v889_v26, 320  ;;  %v956_v14 = vrot.slane %v3629_v28, %v955_v53 }
 0x171   :  { %927 = vbcast.lane.b32.xlu1 %v889_v26, 328  ;;  %v3725_v49 = vpop.xlane.xlu1 %688  ;;  %v3727_v31 = vpop.xlane.xlu0 %685 }
 0x172   :  { %4768 = vst [vmem:[#allocation86_spill] sm:$0xff] %v3725_v49  ;;  %4769 = vst [vmem:[#allocation87_spill] sm:$0xff] %v3727_v31  ;;  %931 = vbcast.lane.b32.xlu0 %v889_v26, 336 }
 0x175   :  { %935 = vbcast.lane.b32.xlu1 %v889_v26, 344  ;;  %v3729_v9 = vpop.xlane.xlu1 %694  ;;  %v3731_v56 = vpop.xlane.xlu0 %691 }
 0x176   :  { %4770 = vst [vmem:[#allocation88_spill] sm:$0xff] %v3729_v9  ;;  %4771 = vst [vmem:[#allocation89_spill] sm:$0xff] %v3731_v56  ;;  %939 = vbcast.lane.b32.xlu0 %v889_v26, 352 }
 0x179   :  { %943 = vbcast.lane.b32.xlu1 %v889_v26, 360  ;;  %v3734_v37 = vpop.xlane.xlu1 %700  ;;  %v3736_v0 = vpop.xlane.xlu0 %697 }
 0x17a   :  { %4772 = vst [vmem:[#allocation90_spill] sm:$0xff] %v3734_v37  ;;  %4773 = vst [vmem:[#allocation91_spill] sm:$0xff] %v3736_v0  ;;  %947 = vbcast.lane.b32.xlu0 %v889_v26, 368 }
 0x17d   :  { %951 = vbcast.lane.b32.xlu1 %v889_v26, 376  ;;  %v3739_v49 = vpop.xlane.xlu1 %706  ;;  %v3741_v31 = vpop.xlane.xlu0 %703 }
 0x17e   :  { %4774 = vst [vmem:[#allocation92_spill] sm:$0xff] %v3739_v49  ;;  %4775 = vst [vmem:[#allocation93_spill] sm:$0xff] %v3741_v31  ;;  %958 = vbcast.lane.b32.xlu0 %v956_v14, 256 }
 0x181   :  { %962 = vbcast.lane.b32.xlu1 %v956_v14, 264  ;;  %v3743_v9 = vpop.xlane.xlu1 %712  ;;  %v3745_v56 = vpop.xlane.xlu0 %709 }
 0x182   :  { %4776 = vst [vmem:[#allocation94_spill] sm:$0xff] %v3743_v9  ;;  %4777 = vst [vmem:[#allocation95_spill] sm:$0xff] %v3745_v56  ;;  %966 = vbcast.lane.b32.xlu0 %v956_v14, 272 }
 0x185   :  { %970 = vbcast.lane.b32.xlu1 %v956_v14, 280  ;;  %v3747_v50 = vpop.xlane.xlu1 %718  ;;  %v3749_v37 = vpop.xlane.xlu0 %715 }
 0x186   :  { %4778 = vst [vmem:[#allocation96_spill] sm:$0xff] %v3747_v50  ;;  %4779 = vst [vmem:[#allocation97_spill] sm:$0xff] %v3749_v37  ;;  %974 = vbcast.lane.b32.xlu0 %v956_v14, 288 }
 0x189   :  { %978 = vbcast.lane.b32.xlu1 %v956_v14, 296  ;;  %v3751_v53 = vpop.xlane.xlu1 %724  ;;  %v3753_v26 = vpop.xlane.xlu0 %721 }
 0x18a   :  { %4780 = vst [vmem:[#allocation98_spill] sm:$0xff] %v3751_v53  ;;  %4781 = vst [vmem:[#allocation99_spill] sm:$0xff] %v3753_v26  ;;  %982 = vbcast.lane.b32.xlu0 %v956_v14, 304  ;;  %v1022_v26 = vsub.s32 4, %v2817_v4 }
 0x18d   :  { %986 = vbcast.lane.b32.xlu1 %v956_v14, 312  ;;  %v3755_v0 = vpop.xlane.xlu1 %730  ;;  %v3757_v31 = vpop.xlane.xlu0 %727 }
 0x18e   :  { %4782 = vst [vmem:[#allocation100_spill] sm:$0xff] %v3755_v0  ;;  %4783 = vst [vmem:[#allocation101_spill] sm:$0xff] %v3757_v31  ;;  %990 = vbcast.lane.b32.xlu0 %v956_v14, 320  ;;  %v1023_v31 = vrot.slane %v3629_v28, %v1022_v26 }
 0x191   :  { %994 = vbcast.lane.b32.xlu1 %v956_v14, 328  ;;  %v3759_v56 = vpop.xlane.xlu1 %736  ;;  %v3761_v9 = vpop.xlane.xlu0 %733 }
 0x192   :  { %4784 = vst [vmem:[#allocation102_spill] sm:$0xff] %v3759_v56  ;;  %4785 = vst [vmem:[#allocation103_spill] sm:$0xff] %v3761_v9  ;;  %998 = vbcast.lane.b32.xlu0 %v956_v14, 336  ;;  %v2786_v56 = vmov 0  }
 0x193   :  { %2758 = vset.pattern.permute.xlu0 %v2786_v56  ;;  %2759 = vset.pattern.permute.xlu1 %v2786_v56 }
 0x195   :  { %1002 = vbcast.lane.b32.xlu1 %v956_v14, 344  ;;  %v3763_v37 = vpop.xlane.xlu1 %742  ;;  %v3765_v50 = vpop.xlane.xlu0 %739 }
 0x196   :  { %4786 = vst [vmem:[#allocation104_spill] sm:$0xff] %v3763_v37  ;;  %4787 = vst [vmem:[#allocation105_spill] sm:$0xff] %v3765_v50  ;;  %1006 = vbcast.lane.b32.xlu0 %v956_v14, 352 }
 0x199   :  { %1010 = vbcast.lane.b32.xlu1 %v956_v14, 360  ;;  %v3768_v53 = vpop.xlane.xlu1 %748  ;;  %v3770_v0 = vpop.xlane.xlu0 %745 }
 0x19a   :  { %4788 = vst [vmem:[#allocation106_spill] sm:$0xff] %v3768_v53  ;;  %4789 = vst [vmem:[#allocation107_spill] sm:$0xff] %v3770_v0  ;;  %1014 = vbcast.lane.b32.xlu0 %v956_v14, 368 }
 0x19d   :  { %1018 = vbcast.lane.b32.xlu1 %v956_v14, 376  ;;  %v3773_v9 = vpop.permute.xlu1 %761  ;;  %v3775_v37 = vpop.permute.xlu0 %757 }
 0x19e   :  { %1025 = vbcast.lane.b32.xlu0 %v1023_v31, 256 }
 0x1a1   :  { %1029 = vbcast.lane.b32.xlu1 %v1023_v31, 264  ;;  %v3777_v50 = vpop.permute.xlu1 %765  ;;  %v3779_v49 = vpop.permute.xlu0 %773 }
 0x1a2   :  { %1033 = vbcast.lane.b32.xlu0 %v1023_v31, 272 }
 0x1a5   :  { %1037 = vbcast.lane.b32.xlu1 %v1023_v31, 280  ;;  %v3781_v0 = vpop.permute.xlu1 %769  ;;  %v3783_v53 = vpop.permute.xlu0 %781 }
 0x1a6   :  { %1041 = vbcast.lane.b32.xlu0 %v1023_v31, 288 }
 0x1a9   :  { %1045 = vbcast.lane.b32.xlu1 %v1023_v31, 296  ;;  %v3785_v56 = vpop.permute.xlu1 %777  ;;  %v3787_v14 = vpop.permute.xlu0 %789 }
 0x1aa   :  { %1049 = vbcast.lane.b32.xlu0 %v1023_v31, 304 }
 0x1ad   :  { %1053 = vbcast.lane.b32.xlu1 %v1023_v31, 312  ;;  %v3789_v26 = vpop.permute.xlu1 %785  ;;  %v3791_v62 = vpop.permute.xlu0 %797 }
 0x1ae   :  { %1057 = vbcast.lane.b32.xlu0 %v1023_v31, 320 }
 0x1b1   :  { %1061 = vbcast.lane.b32.xlu1 %v1023_v31, 328  ;;  %v3793_v15 = vpop.permute.xlu1 %793  ;;  %v3795_v40 = vpop.permute.xlu0 %805 }
 0x1b2   :  { %1065 = vbcast.lane.b32.xlu0 %v1023_v31, 336 }
 0x1b5   :  { %1069 = vbcast.lane.b32.xlu1 %v1023_v31, 344  ;;  %v3797_v48 = vpop.permute.xlu1 %801  ;;  %v3799_v27 = vpop.permute.xlu0 %813 }
 0x1b6   :  { %1073 = vbcast.lane.b32.xlu0 %v1023_v31, 352 }
 0x1b9   :  { %1077 = vbcast.lane.b32.xlu1 %v1023_v31, 360  ;;  %v3802_v3 = vpop.permute.xlu1 %809  ;;  %v3804_v2 = vpop.permute.xlu0 %824 }
 0x1ba   :  { %1081 = vbcast.lane.b32.xlu0 %v1023_v31, 368 }
 0x1bd   :  { %1085 = vbcast.lane.b32.xlu1 %v1023_v31, 376  ;;  %v3807_v41 = vpop.permute.xlu1 %817  ;;  %v3809_v17 = vpop.permute.xlu0 %832 }
 0x1be   :  { %1092 = vbcast.lane.b32.xlu0 %v1090_v51, 256 }
 0x1c1   :  { %1096 = vbcast.lane.b32.xlu1 %v1090_v51, 264  ;;  %v3811_v16 = vpop.permute.xlu1 %828  ;;  %v3813_v57 = vpop.permute.xlu0 %840 }
 0x1c2   :  { %1100 = vbcast.lane.b32.xlu0 %v1090_v51, 272 }
 0x1c5   :  { %1104 = vbcast.lane.b32.xlu1 %v1090_v51, 280  ;;  %v3815_v35 = vpop.permute.xlu1 %836  ;;  %v3817_v7 = vpop.permute.xlu0 %848 }
 0x1c6   :  { %1108 = vbcast.lane.b32.xlu0 %v1090_v51, 288 }
 0x1c9   :  { %1112 = vbcast.lane.b32.xlu1 %v1090_v51, 296  ;;  %v3819_v34 = vpop.permute.xlu1 %844  ;;  %v3821_v31 = vpop.permute.xlu0 %856 }
 0x1ca   :  { %1116 = vbcast.lane.b32.xlu0 %v1090_v51, 304 }
 0x1cd   :  { %1120 = vbcast.lane.b32.xlu1 %v1090_v51, 312  ;;  %v3823_v42 = vpop.permute.xlu1 %852  ;;  %v3825_v25 = vpop.permute.xlu0 %864 }
 0x1ce   :  { %4790 = vst [vmem:[#allocation108_spill] sm:$0xff] %v3825_v25  ;;  %1124 = vbcast.lane.b32.xlu0 %v1090_v51, 320  ;;  %v1157_v25 = vrot.slane %v3629_v28, %v1156_v47 }
 0x1d1   :  { %1128 = vbcast.lane.b32.xlu1 %v1090_v51, 328  ;;  %v3827_v24 = vpop.permute.xlu1 %860  ;;  %v3829_v61 = vpop.permute.xlu0 %872 }
 0x1d2   :  { %4791 = vst [vmem:[#allocation109_spill] sm:$0xff] %v3829_v61  ;;  %1132 = vbcast.lane.b32.xlu0 %v1090_v51, 336 }
 0x1d5   :  { %1136 = vbcast.lane.b32.xlu1 %v1090_v51, 344  ;;  %v3831_v58 = vpop.permute.xlu1 %868  ;;  %v3833_v13 = vpop.permute.xlu0 %880 }
 0x1d6   :  { %4792 = vst [vmem:[#allocation110_spill] sm:$0xff] %v3831_v58  ;;  %4793 = vst [vmem:[#allocation111_spill] sm:$0xff] %v3833_v13  ;;  %1140 = vbcast.lane.b32.xlu0 %v1090_v51, 352 }
 0x1d9   :  { %1144 = vbcast.lane.b32.xlu1 %v1090_v51, 360  ;;  %v3836_v38 = vpop.permute.xlu1 %876  ;;  %v3838_v32 = vpop.permute.xlu0 %891 }
 0x1da   :  { %4794 = vst [vmem:[#allocation112_spill] sm:$0xff] %v3836_v38  ;;  %4795 = vst [vmem:[#allocation113_spill] sm:$0xff] %v3838_v32  ;;  %1148 = vbcast.lane.b32.xlu0 %v1090_v51, 368 }
 0x1dd   :  { %1152 = vbcast.lane.b32.xlu1 %v1090_v51, 376  ;;  %v3841_v19 = vpop.permute.xlu1 %884  ;;  %v3843_v61 = vpop.permute.xlu0 %899 }
 0x1de   :  { %4796 = vst [vmem:[#allocation114_spill] sm:$0xff] %v3843_v61  ;;  %1159 = vbcast.lane.b32.xlu0 %v1157_v25, 256 }
 0x1e1   :  { %1163 = vbcast.lane.b32.xlu1 %v1157_v25, 264  ;;  %v3845_v58 = vpop.permute.xlu1 %895  ;;  %v3847_v13 = vpop.permute.xlu0 %907 }
 0x1e2   :  { %4797 = vst [vmem:[#allocation115_spill] sm:$0xff] %v3845_v58  ;;  %4798 = vst [vmem:[#allocation116_spill] sm:$0xff] %v3847_v13  ;;  %1167 = vbcast.lane.b32.xlu0 %v1157_v25, 272 }
 0x1e5   :  { %1171 = vbcast.lane.b32.xlu1 %v1157_v25, 280  ;;  %v3849_v18 = vpop.permute.xlu1 %903  ;;  %v3851_v38 = vpop.permute.xlu0 %915 }
 0x1e6   :  { %4799 = vst [vmem:[#allocation117_spill] sm:$0xff] %v3849_v18  ;;  %4800 = vst [vmem:[#allocation118_spill] sm:$0xff] %v3851_v38  ;;  %1175 = vbcast.lane.b32.xlu0 %v1157_v25, 288 }
 0x1e9   :  { %1179 = vbcast.lane.b32.xlu1 %v1157_v25, 296  ;;  %v3853_v47 = vpop.permute.xlu1 %911  ;;  %v3855_v51 = vpop.permute.xlu0 %923 }
 0x1ea   :  { %4801 = vst [vmem:[#allocation119_spill] sm:$0xff] %v3853_v47  ;;  %4802 = vst [vmem:[#allocation120_spill] sm:$0xff] %v3855_v51  ;;  %1183 = vbcast.lane.b32.xlu0 %v1157_v25, 304  ;;  %v1223_v51 = vsub.s32 7, %v2817_v4 }
 0x1ed   :  { %1187 = vbcast.lane.b32.xlu1 %v1157_v25, 312  ;;  %v3857_v61 = vpop.permute.xlu1 %919  ;;  %v3859_v32 = vpop.permute.xlu0 %931 }
 0x1ee   :  { %4803 = vst [vmem:[#allocation121_spill] sm:$0xff] %v3857_v61  ;;  %4804 = vst [vmem:[#allocation122_spill] sm:$0xff] %v3859_v32  ;;  %1191 = vbcast.lane.b32.xlu0 %v1157_v25, 320  ;;  %v1224_v32 = vrot.slane %v3629_v28, %v1223_v51 }
 0x1f1   :  { %1195 = vbcast.lane.b32.xlu1 %v1157_v25, 328  ;;  %v3861_v13 = vpop.permute.xlu1 %927  ;;  %v3863_v58 = vpop.permute.xlu0 %939 }
 0x1f2   :  { %4805 = vst [vmem:[#allocation123_spill] sm:$0xff] %v3861_v13  ;;  %4806 = vst [vmem:[#allocation124_spill] sm:$0xff] %v3863_v58  ;;  %1199 = vbcast.lane.b32.xlu0 %v1157_v25, 336 }
 0x1f5   :  { %1203 = vbcast.lane.b32.xlu1 %v1157_v25, 344  ;;  %v3865_v38 = vpop.permute.xlu1 %935  ;;  %v3867_v18 = vpop.permute.xlu0 %947 }
 0x1f6   :  { %4807 = vst [vmem:[#allocation125_spill] sm:$0xff] %v3865_v38  ;;  %4808 = vst [vmem:[#allocation126_spill] sm:$0xff] %v3867_v18  ;;  %1207 = vbcast.lane.b32.xlu0 %v1157_v25, 352 }
 0x1f9   :  { %1211 = vbcast.lane.b32.xlu1 %v1157_v25, 360  ;;  %v3870_v47 = vpop.permute.xlu1 %943  ;;  %v3872_v61 = vpop.permute.xlu0 %958 }
 0x1fa   :  { %4809 = vst [vmem:[#allocation127_spill] sm:$0xff] %v3870_v47  ;;  %4810 = vst [vmem:[#allocation128_spill] sm:$0xff] %v3872_v61  ;;  %1215 = vbcast.lane.b32.xlu0 %v1157_v25, 368 }
 0x1fd   :  { %1219 = vbcast.lane.b32.xlu1 %v1157_v25, 376  ;;  %v3875_v13 = vpop.permute.xlu1 %951  ;;  %v3877_v58 = vpop.permute.xlu0 %966 }
 0x1fe   :  { %4811 = vst [vmem:[#allocation129_spill] sm:$0xff] %v3877_v58  ;;  %1226 = vbcast.lane.b32.xlu0 %v1224_v32, 256 }
 0x201   :  { %1230 = vbcast.lane.b32.xlu1 %v1224_v32, 264  ;;  %v3879_v38 = vpop.permute.xlu1 %962  ;;  %v3881_v18 = vpop.permute.xlu0 %974 }
 0x202   :  { %4812 = vst [vmem:[#allocation130_spill] sm:$0xff] %v3881_v18  ;;  %1234 = vbcast.lane.b32.xlu0 %v1224_v32, 272 }
 0x205   :  { %1238 = vbcast.lane.b32.xlu1 %v1224_v32, 280  ;;  %v3883_v4 = vpop.permute.xlu1 %970  ;;  %v3885_v47 = vpop.permute.xlu0 %982 }
 0x206   :  { %4813 = vst [vmem:[#allocation131_spill] sm:$0xff] %v3883_v4  ;;  %4814 = vst [vmem:[#allocation132_spill] sm:$0xff] %v3885_v47  ;;  %1242 = vbcast.lane.b32.xlu0 %v1224_v32, 288 }
 0x209   :  { %1246 = vbcast.lane.b32.xlu1 %v1224_v32, 296  ;;  %v3887_v28 = vpop.permute.xlu1 %978  ;;  %v3889_v25 = vpop.permute.xlu0 %990 }
 0x20a   :  { %4815 = vst [vmem:[#allocation133_spill] sm:$0xff] %v3887_v28  ;;  %4816 = vst [vmem:[#allocation134_spill] sm:$0xff] %v3889_v25  ;;  %1250 = vbcast.lane.b32.xlu0 %v1224_v32, 304 }
 0x20d   :  { %1254 = vbcast.lane.b32.xlu1 %v1224_v32, 312  ;;  %v3891_v51 = vpop.permute.xlu1 %986  ;;  %v3893_v58 = vpop.permute.xlu0 %998 }
 0x20e   :  { %4817 = vst [vmem:[#allocation135_spill] sm:$0xff] %v3891_v51  ;;  %4818 = vst [vmem:[#allocation136_spill] sm:$0xff] %v3893_v58  ;;  %1258 = vbcast.lane.b32.xlu0 %v1224_v32, 320  ;;  %v1416_v58 = vadd.f32 %v3775_v37, %v3224_v11  ;;  %v1418_v11 = vadd.f32 %v3777_v50, %v3222_v8  ;;  %v1422_v8 = vadd.f32 %v3783_v53, %v3270_v39 }
 0x20f   :  { %v1426_v39 = vadd.f32 %v3791_v62, %v3298_v12  ;;  %v1430_v12 = vadd.f32 %v3799_v27, %v3326_v6  ;;  %v1434_v6 = vadd.f32 %v3809_v17, %v3355_v36  ;;  %v1438_v36 = vadd.f32 %v3817_v7, %v3387_v55  ;;  %v4826_v55 = vld [vmem:[#allocation7_spill] sm:$0xff]  ;;  %v4828_v7 = vld [vmem:[#allocation8_spill] sm:$0xff] }
 0x211   :  { %1262 = vbcast.lane.b32.xlu1 %v1224_v32, 328  ;;  %v3895_v18 = vpop.permute.xlu1 %994  ;;  %v3897_v61 = vpop.permute.xlu0 %1006 }
 0x212   :  { %4819 = vst [vmem:[#allocation137_spill] sm:$0xff] %v3895_v18  ;;  %4820 = vst [vmem:[#allocation138_spill] sm:$0xff] %v3897_v61  ;;  %1266 = vbcast.lane.b32.xlu0 %v1224_v32, 336 }
 0x215   :  { %1270 = vbcast.lane.b32.xlu1 %v1224_v32, 344  ;;  %v3899_v47 = vpop.permute.xlu1 %1002  ;;  %v3901_v4 = vpop.permute.xlu0 %1014 }
 0x216   :  { %4821 = vst [vmem:[#allocation139_spill] sm:$0xff] %v3899_v47  ;;  %4822 = vst [vmem:[#allocation140_spill] sm:$0xff] %v3901_v4  ;;  %1274 = vbcast.lane.b32.xlu0 %v1224_v32, 352  ;;  %v1417_v47 = vadd.f32 %v3773_v9, %v3239_v22  ;;  %v1419_v4 = vadd.f32 %v3781_v0, %v3237_v21  ;;  %v1420_v21 = vadd.f32 %v3779_v49, %v3253_v30 }
 0x217   :  { %v1423_v22 = vadd.f32 %v3789_v26, %v3268_v10  ;;  %v1424_v30 = vadd.f32 %v3787_v14, %v3284_v44  ;;  %v1427_v10 = vadd.f32 %v3797_v48, %v3296_v52  ;;  %v1428_v44 = vadd.f32 %v3795_v40, %v3312_v60 }
 0x218   :  { %v1431_v52 = vadd.f32 %v3807_v41, %v3324_v5  ;;  %v1432_v60 = vadd.f32 %v3804_v2, %v3340_v23  ;;  %v1435_v5 = vadd.f32 %v3815_v35, %v3353_v33  ;;  %v1436_v23 = vadd.f32 %v3813_v57, %v3371_v46 }
 0x219   :  { %1278 = vbcast.lane.b32.xlu1 %v1224_v32, 360  ;;  %v3903_v25 = vpop.permute.xlu1 %1010  ;;  %v3905_v28 = vpop.permute.xlu0 %1025  ;;  %v1439_v33 = vadd.f32 %v3823_v42, %v3385_v54  ;;  %v1440_v46 = vadd.f32 %v3821_v31, %v3401_v1  ;;  %v4824_v54 = vld [vmem:[#allocation6_spill] sm:$0xff]  ;;  %v4830_v1 = vld [vmem:[#allocation9_spill] sm:$0xff] }
 0x21a   :  { %4823 = vst [vmem:[#allocation141_spill] sm:$0xff] %v3905_v28  ;;  %1282 = vbcast.lane.b32.xlu0 %v1224_v32, 368  ;;  %v4825_v42 = vld [vmem:[#allocation110_spill] sm:$0xff]  ;;  %v4831_v31 = vld [vmem:[#allocation109_spill] sm:$0xff] }
 0x21b   :  { %v1443_v57 = vadd.f32 %v4825_v42, %v4824_v54  ;;  %v4841_v42 = vld [vmem:[#allocation15_spill] sm:$0xff] }
 0x21d   :  { %1286 = vbcast.lane.b32.xlu1 %v1224_v32, 376  ;;  %v3909_v18 = vpop.permute.xlu1 %1018  ;;  %v3911_v61 = vpop.permute.xlu0 %1033  ;;  %v1421_v32 = vadd.f32 %v3785_v56, %v3251_v29  ;;  %v1425_v29 = vadd.f32 %v3793_v15, %v3282_v43  ;;  %v1429_v43 = vadd.f32 %v3802_v3, %v3310_v59  ;;  %v1433_v59 = vadd.f32 %v3811_v16, %v3338_v20 }
 0x21e   :  { %1674 = vperm.xlu0 %2758, %v1416_v58   ;;  %v1437_v20 = vadd.f32 %v3819_v34, %v3369_v45  ;;  %v1441_v45 = vadd.f32 %v3827_v24, %v3399_v63  ;;  %v4827_v63 = vld [vmem:[#allocation108_spill] sm:$0xff] }
 0x21f   :  { %v1442_v24 = vadd.f32 %v4827_v63, %v4826_v55  ;;  %v4843_v63 = vld [vmem:[#allocation16_spill] sm:$0xff] }
 0x221   :  { %v3917_v51 = vpop.permute.xlu1 %1029  ;;  %1677 = vperm.xlu1 %2759, %v1417_v47   ;;  %v3919_v28 = vpop.permute.xlu0 %1041 }
 0x222   :  { %1683 = vperm.xlu0 %2758, %v1419_v4  }
 0x225   :  { %v3925_v37 = vpop.permute.xlu1 %1037  ;;  %1680 = vperm.xlu1 %2759, %v1418_v11   ;;  %v3927_v58 = vpop.permute.xlu0 %1049  ;;  %v4829_v11 = vld [vmem:[#allocation112_spill] sm:$0xff] }
 0x226   :  { %1689 = vperm.xlu0 %2758, %v1421_v32   ;;  %v1445_v32 = vadd.f32 %v4829_v11, %v4828_v7 }
 0x229   :  { %v3933_v0 = vpop.permute.xlu1 %1045  ;;  %1686 = vperm.xlu1 %2759, %v1420_v21   ;;  %v3935_v4 = vpop.permute.xlu0 %1057 }
 0x22a   :  { %1695 = vperm.xlu0 %2758, %v1423_v22  }
 0x22d   :  { %v3941_v50 = vpop.permute.xlu1 %1053  ;;  %1692 = vperm.xlu1 %2759, %v1422_v8   ;;  %v3943_v9 = vpop.permute.xlu0 %1065  ;;  %v1444_v8 = vadd.f32 %v4831_v31, %v4830_v1  ;;  %v4845_v1 = vld [vmem:[#allocation17_spill] sm:$0xff]  ;;  %v4846_v31 = vld [vmem:[#allocation116_spill] sm:$0xff] }
 0x22e   :  { %1701 = vperm.xlu0 %2758, %v1425_v29   ;;  %v4832_v29 = vld [vmem:[#allocation10_spill] sm:$0xff] }
 0x231   :  { %v3949_v49 = vpop.permute.xlu1 %1061  ;;  %1698 = vperm.xlu1 %2759, %v1424_v30   ;;  %v3951_v56 = vpop.permute.xlu0 %1073  ;;  %v1447_v30 = vadd.f32 %v3841_v19, %v4832_v29  ;;  %v4838_v19 = vld [vmem:[#allocation113_spill] sm:$0xff]  ;;  %v4847_v29 = vld [vmem:[#allocation18_spill] sm:$0xff] }
 0x232   :  { %1707 = vperm.xlu0 %2758, %v1427_v10  }
 0x235   :  { %v3957_v15 = vpop.permute.xlu1 %1069  ;;  %1704 = vperm.xlu1 %2759, %v1426_v39   ;;  %v3959_v53 = vpop.permute.xlu0 %1081 }
 0x236   :  { %1713 = vperm.xlu0 %2758, %v1429_v43   ;;  %v4833_v43 = vld [vmem:[#allocation11_spill] sm:$0xff] }
 0x239   :  { %v3965_v48 = vpop.permute.xlu1 %1077  ;;  %1710 = vperm.xlu1 %2759, %v1428_v44   ;;  %v3967_v14 = vpop.permute.xlu0 %1092  ;;  %v4834_v44 = vld [vmem:[#allocation111_spill] sm:$0xff] }
 0x23a   :  { %1719 = vperm.xlu0 %2758, %v1431_v52   ;;  %v1446_v52 = vadd.f32 %v4834_v44, %v4833_v43 }
 0x23d   :  { %v3973_v3 = vpop.permute.xlu1 %1085  ;;  %1716 = vperm.xlu1 %2759, %v1430_v12   ;;  %v3975_v62 = vpop.permute.xlu0 %1100  ;;  %v4835_v12 = vld [vmem:[#allocation12_spill] sm:$0xff] }
 0x23e   :  { %1725 = vperm.xlu0 %2758, %v1433_v59   ;;  %v4836_v59 = vld [vmem:[#allocation115_spill] sm:$0xff] }
 0x241   :  { %v3981_v41 = vpop.permute.xlu1 %1096  ;;  %1722 = vperm.xlu1 %2759, %v1432_v60   ;;  %v3983_v40 = vpop.permute.xlu0 %1108  ;;  %v1449_v60 = vadd.f32 %v4836_v59, %v4835_v12  ;;  %v4849_v12 = vld [vmem:[#allocation19_spill] sm:$0xff]  ;;  %v4850_v59 = vld [vmem:[#allocation118_spill] sm:$0xff] }
 0x242   :  { %1731 = vperm.xlu0 %2758, %v1435_v5  }
 0x245   :  { %v3989_v16 = vpop.permute.xlu1 %1104  ;;  %1728 = vperm.xlu1 %2759, %v1434_v6   ;;  %v3991_v27 = vpop.permute.xlu0 %1116 }
 0x246   :  { %1737 = vperm.xlu0 %2758, %v1437_v20   ;;  %v4837_v20 = vld [vmem:[#allocation13_spill] sm:$0xff] }
 0x249   :  { %v3997_v35 = vpop.permute.xlu1 %1112  ;;  %1734 = vperm.xlu1 %2759, %v1436_v23   ;;  %v3999_v2 = vpop.permute.xlu0 %1124  ;;  %v1448_v23 = vadd.f32 %v4838_v19, %v4837_v20  ;;  %v4851_v20 = vld [vmem:[#allocation20_spill] sm:$0xff]  ;;  %v4852_v19 = vld [vmem:[#allocation123_spill] sm:$0xff] }
 0x24a   :  { %1743 = vperm.xlu0 %2758, %v1439_v33   ;;  %v4839_v33 = vld [vmem:[#allocation14_spill] sm:$0xff] }
 0x24d   :  { %v4005_v17 = vpop.permute.xlu1 %1120  ;;  %1740 = vperm.xlu1 %2759, %v1438_v36   ;;  %v4007_v26 = vpop.permute.xlu0 %1132  ;;  %v4840_v36 = vld [vmem:[#allocation117_spill] sm:$0xff] }
 0x24e   :  { %1749 = vperm.xlu0 %2758, %v1441_v45   ;;  %v1451_v45 = vadd.f32 %v4840_v36, %v4839_v33 }
 0x251   :  { %v4013_v34 = vpop.permute.xlu1 %1128  ;;  %1746 = vperm.xlu1 %2759, %v1440_v46   ;;  %v4015_v47 = vpop.permute.xlu0 %1140 }
 0x252   :  { %1755 = vperm.xlu0 %2758, %v1443_v57   ;;  %v4842_v57 = vld [vmem:[#allocation114_spill] sm:$0xff] }
 0x253   :  { %v1450_v55 = vadd.f32 %v4842_v57, %v4841_v42  ;;  %v4855_v42 = vld [vmem:[#allocation120_spill] sm:$0xff] }
 0x255   :  { %v4021_v21 = vpop.permute.xlu1 %1136  ;;  %1752 = vperm.xlu1 %2759, %v1442_v24   ;;  %v4023_v22 = vpop.permute.xlu0 %1148  ;;  %v4844_v24 = vld [vmem:[#allocation119_spill] sm:$0xff] }
 0x256   :  { %1761 = vperm.xlu0 %2758, %v1445_v32   ;;  %v1453_v7 = vadd.f32 %v4844_v24, %v4843_v63  ;;  %v4857_v63 = vld [vmem:[#allocation125_spill] sm:$0xff] }
 0x259   :  { %v4029_v10 = vpop.permute.xlu1 %1144  ;;  %1758 = vperm.xlu1 %2759, %v1444_v8   ;;  %v4031_v39 = vpop.permute.xlu0 %1159  ;;  %v1452_v8 = vadd.f32 %v4846_v31, %v4845_v1  ;;  %v4859_v31 = vld [vmem:[#allocation23_spill] sm:$0xff] }
 0x25a   :  { %1767 = vperm.xlu0 %2758, %v1447_v30   ;;  %v4848_v30 = vld [vmem:[#allocation121_spill] sm:$0xff] }
 0x25b   :  { %v1455_v43 = vadd.f32 %v4848_v30, %v4847_v29  ;;  %v4861_v30 = vld [vmem:[#allocation24_spill] sm:$0xff] }
 0x25d   :  { %v4037_v5 = vpop.permute.xlu1 %1152  ;;  %1764 = vperm.xlu1 %2759, %v1446_v52   ;;  %v4039_v6 = vpop.permute.xlu0 %1167 }
 0x25e   :  { %1773 = vperm.xlu0 %2758, %v1449_v60   ;;  %v1454_v60 = vadd.f32 %v4850_v59, %v4849_v12 }
 0x261   :  { %v4045_v46 = vpop.permute.xlu1 %1163  ;;  %1770 = vperm.xlu1 %2759, %v1448_v23   ;;  %v4047_v54 = vpop.permute.xlu0 %1175  ;;  %v1457_v23 = vadd.f32 %v4852_v19, %v4851_v20  ;;  %v4865_v20 = vld [vmem:[#allocation25_spill] sm:$0xff]  ;;  %v4866_v19 = vld [vmem:[#allocation124_spill] sm:$0xff] }
 0x262   :  { %1779 = vperm.xlu0 %2758, %v1451_v45   ;;  %v4854_v45 = vld [vmem:[#allocation21_spill] sm:$0xff] }
 0x263   :  { %v1456_v57 = vadd.f32 %v4855_v42, %v4854_v45  ;;  %v4867_v45 = vld [vmem:[#allocation26_spill] sm:$0xff] }
 0x264   :  { %v1463_v42 = vadd.f32 %v3875_v13, %v4867_v45  ;;  %v4874_v13 = vld [vmem:[#allocation128_spill] sm:$0xff] }
 0x265   :  { %v4053_v11 = vpop.permute.xlu1 %1171  ;;  %1776 = vperm.xlu1 %2759, %v1450_v55   ;;  %v4055_v32 = vpop.permute.xlu0 %1183  ;;  %v4856_v55 = vld [vmem:[#allocation22_spill] sm:$0xff] }
 0x266   :  { %1785 = vperm.xlu0 %2758, %v1453_v7   ;;  %v1459_v24 = vadd.f32 %v4857_v63, %v4856_v55  ;;  %v4869_v63 = vld [vmem:[#allocation27_spill] sm:$0xff] }
 0x269   :  { %v4061_v44 = vpop.permute.xlu1 %1179  ;;  %1782 = vperm.xlu1 %2759, %v1452_v8   ;;  %v4063_v52 = vpop.permute.xlu0 %1191  ;;  %v4860_v8 = vld [vmem:[#allocation122_spill] sm:$0xff] }
 0x26a   :  { %1791 = vperm.xlu0 %2758, %v1455_v43   ;;  %v1458_v29 = vadd.f32 %v4860_v8, %v4859_v31  ;;  %v4862_v43 = vld [vmem:[#allocation127_spill] sm:$0xff]  ;;  %v4871_v8 = vld [vmem:[#allocation28_spill] sm:$0xff] }
 0x26b   :  { %v1461_v12 = vadd.f32 %v4862_v43, %v4861_v30 }
 0x26d   :  { %v4069_v33 = vpop.permute.xlu1 %1187  ;;  %1788 = vperm.xlu1 %2759, %v1454_v60   ;;  %v4071_v36 = vpop.permute.xlu0 %1199 }
 0x26e   :  { %4853 = vst [vmem:[#allocation6_spill] sm:$0xff] %v4071_v36  ;;  %1797 = vperm.xlu0 %2758, %v1457_v23   ;;  %v1460_v23 = vadd.f32 %v4866_v19, %v4865_v20  ;;  %v4875_v19 = vld [vmem:[#allocation30_spill] sm:$0xff] }
 0x271   :  { %v4077_v7 = vpop.permute.xlu1 %1195  ;;  %1794 = vperm.xlu1 %2759, %v1456_v57   ;;  %v4079_v1 = vpop.permute.xlu0 %1207 }
 0x272   :  { %4858 = vst [vmem:[#allocation110_spill] sm:$0xff] %v4079_v1  ;;  %1803 = vperm.xlu0 %2758, %v1459_v24   ;;  %v4870_v24 = vld [vmem:[#allocation126_spill] sm:$0xff] }
 0x273   :  { %v1462_v31 = vadd.f32 %v4870_v24, %v4869_v63  ;;  %v4878_v63 = vld [vmem:[#allocation31_spill] sm:$0xff] }
 0x275   :  { %v4085_v59 = vpop.permute.xlu1 %1203  ;;  %1800 = vperm.xlu1 %2759, %v1458_v29   ;;  %v4087_v60 = vpop.permute.xlu0 %1215  ;;  %v1465_v29 = vadd.f32 %v3879_v38, %v4871_v8  ;;  %v4879_v38 = vld [vmem:[#allocation129_spill] sm:$0xff]  ;;  %v4880_v8 = vld [vmem:[#allocation32_spill] sm:$0xff] }
 0x276   :  { %4863 = vst [vmem:[#allocation7_spill] sm:$0xff] %v4085_v59  ;;  %4864 = vst [vmem:[#allocation108_spill] sm:$0xff] %v4087_v60  ;;  %1809 = vperm.xlu0 %2758, %v1461_v12   ;;  %v4873_v12 = vld [vmem:[#allocation29_spill] sm:$0xff]  ;;  %v1466_v24 = vadd.f32 %v4879_v38, %v4878_v63  ;;  %v4888_v63 = vld [vmem:[#allocation35_spill] sm:$0xff] }
 0x277   :  { %v1464_v20 = vadd.f32 %v4874_v13, %v4873_v12  ;;  %v4883_v12 = vld [vmem:[#allocation33_spill] sm:$0xff]  ;;  %v4884_v13 = vld [vmem:[#allocation130_spill] sm:$0xff]  ;;  %v4889_v38 = vld [vmem:[#allocation132_spill] sm:$0xff] }
 0x279   :  { %v4093_v57 = vpop.permute.xlu1 %1211  ;;  %1806 = vperm.xlu1 %2759, %v1460_v23   ;;  %v4095_v55 = vpop.permute.xlu0 %1226  ;;  %v4876_v23 = vld [vmem:[#allocation131_spill] sm:$0xff] }
 0x27a   :  { %4868 = vst [vmem:[#allocation8_spill] sm:$0xff] %v4093_v57  ;;  %1815 = vperm.xlu0 %2758, %v1463_v42   ;;  %v1467_v45 = vadd.f32 %v4876_v23, %v4875_v19  ;;  %v1468_v19 = vadd.f32 %v4884_v13, %v4883_v12  ;;  %v4885_v23 = vld [vmem:[#allocation34_spill] sm:$0xff]  ;;  %v4894_v12 = vld [vmem:[#allocation37_spill] sm:$0xff] }
 0x27b   :  { %v4895_v13 = vld [vmem:[#allocation134_spill] sm:$0xff] }
 0x27d   :  { %v4101_v30 = vpop.permute.xlu1 %1219  ;;  %1812 = vperm.xlu1 %2759, %v1462_v31   ;;  %v4103_v43 = vpop.permute.xlu0 %1234  ;;  %v4881_v31 = vld [vmem:[#allocation133_spill] sm:$0xff] }
 0x27e   :  { %4872 = vst [vmem:[#allocation112_spill] sm:$0xff] %v4101_v30  ;;  %1821 = vperm.xlu0 %2758, %v1465_v29   ;;  %v1469_v30 = vadd.f32 %v4881_v31, %v4880_v8  ;;  %v1470_v8 = vadd.f32 %v4889_v38, %v4888_v63  ;;  %v4890_v31 = vld [vmem:[#allocation36_spill] sm:$0xff] }
 0x27f   :  { %v4900_v63 = vld [vmem:[#allocation136_spill] sm:$0xff] }
 0x281   :  { %v4109_v60 = vpop.permute.xlu1 %1230  ;;  %1818 = vperm.xlu1 %2759, %v1464_v20   ;;  %v4111_v42 = vpop.permute.xlu0 %1242  ;;  %v4886_v20 = vld [vmem:[#allocation135_spill] sm:$0xff] }
 0x282   :  { %4877 = vst [vmem:[#allocation9_spill] sm:$0xff] %v4111_v42  ;;  %1827 = vperm.xlu0 %2758, %v1467_v45   ;;  %v1471_v1 = vadd.f32 %v4886_v20, %v4885_v23  ;;  %v1472_v23 = vadd.f32 %v4895_v13, %v4894_v12  ;;  %v4896_v20 = vld [vmem:[#allocation38_spill] sm:$0xff] }
 0x283   :  { %v4905_v12 = vld [vmem:[#allocation138_spill] sm:$0xff] }
 0x285   :  { %v4117_v57 = vpop.permute.xlu1 %1238  ;;  %1824 = vperm.xlu1 %2759, %v1466_v24   ;;  %v4119_v29 = vpop.permute.xlu0 %1250  ;;  %v4891_v24 = vld [vmem:[#allocation137_spill] sm:$0xff] }
 0x286   :  { %4882 = vst [vmem:[#allocation109_spill] sm:$0xff] %v4119_v29  ;;  %1833 = vperm.xlu0 %2758, %v1469_v30   ;;  %v1473_v36 = vadd.f32 %v4891_v24, %v4890_v31  ;;  %v4902_v24 = vld [vmem:[#allocation40_spill] sm:$0xff] }
 0x289   :  { %v4125_v59 = vpop.permute.xlu1 %1246  ;;  %1830 = vperm.xlu1 %2759, %v1468_v19   ;;  %v4127_v45 = vpop.permute.xlu0 %1258  ;;  %v4897_v19 = vld [vmem:[#allocation139_spill] sm:$0xff] }
 0x28a   :  { %4887 = vst [vmem:[#allocation10_spill] sm:$0xff] %v4127_v45  ;;  %1839 = vperm.xlu0 %2758, %v1471_v1   ;;  %v1475_v42 = vadd.f32 %v4897_v19, %v4896_v20  ;;  %v4899_v1 = vld [vmem:[#allocation39_spill] sm:$0xff]  ;;  %v4906_v20 = vld [vmem:[#allocation42_spill] sm:$0xff] }
 0x28b   :  { %v1474_v38 = vadd.f32 %v4900_v63, %v4899_v1  ;;  %v1479_v19 = vadd.f32 %v3909_v18, %v4906_v20  ;;  %v4909_v1 = vld [vmem:[#allocation43_spill] sm:$0xff]  ;;  %v4910_v63 = vld [vmem:[#allocation140_spill] sm:$0xff]  ;;  %v4914_v18 = vld [vmem:[#allocation141_spill] sm:$0xff] }
 0x28c   :  { %v4915_v20 = vld [vmem:[#allocation46_spill] sm:$0xff] }
 0x28d   :  { %v4133_v29 = vpop.permute.xlu1 %1254  ;;  %1836 = vperm.xlu1 %2759, %v1470_v8   ;;  %v4135_v30 = vpop.permute.xlu0 %1266  ;;  %v1477_v8 = vadd.f32 %v3903_v25, %v4902_v24  ;;  %v4911_v25 = vld [vmem:[#allocation44_spill] sm:$0xff] }
 0x28e   :  { %4892 = vst [vmem:[#allocation11_spill] sm:$0xff] %v4133_v29  ;;  %4893 = vst [vmem:[#allocation111_spill] sm:$0xff] %v4135_v30  ;;  %1845 = vperm.xlu0 %2758, %v1473_v36   ;;  %v4904_v36 = vld [vmem:[#allocation41_spill] sm:$0xff]  ;;  %v1481_v24 = vadd.f32 %v3917_v51, %v4911_v25 }
 0x28f   :  { %v1476_v13 = vadd.f32 %v4905_v12, %v4904_v36  ;;  %v4913_v36 = vld [vmem:[#allocation45_spill] sm:$0xff] }
 0x290   :  { %v1480_v12 = vadd.f32 %v4914_v18, %v4913_v36  ;;  %v4918_v36 = vld [vmem:[#allocation49_spill] sm:$0xff]  ;;  %v4919_v18 = vld [vmem:[#allocation50_spill] sm:$0xff] }
 0x291   :  { %v4141_v45 = vpop.permute.xlu1 %1262  ;;  %1842 = vperm.xlu1 %2759, %v1472_v23   ;;  %v4145_v31 = vpop.permute.xlu0 %1274 }
 0x292   :  { %4898 = vst [vmem:[#allocation12_spill] sm:$0xff] %v4141_v45  ;;  %1851 = vperm.xlu0 %2758, %v1475_v42   ;;  %4901 = vst [vmem:[#allocation115_spill] sm:$0xff] %v4145_v31  ;;  %v1478_v31 = vadd.f32 %v4910_v63, %v4909_v1  ;;  %v4916_v1 = vld [vmem:[#allocation47_spill] sm:$0xff]  ;;  %v4917_v63 = vld [vmem:[#allocation48_spill] sm:$0xff] }
 0x293   :  { %v1482_v51 = vadd.f32 %v3911_v61, %v4916_v1  ;;  %v4920_v61 = vld [vmem:[#allocation51_spill] sm:$0xff]  ;;  %v4921_v1 = vld [vmem:[#allocation52_spill] sm:$0xff] }
 0x295   :  { %v4149_v30 = vpop.permute.xlu1 %1270  ;;  %1848 = vperm.xlu1 %2759, %v1474_v38   ;;  %v4155_v23 = vpop.permute.xlu0 %1282 }
 0x296   :  { %4903 = vst [vmem:[#allocation13_spill] sm:$0xff] %v4149_v30  ;;  %1857 = vperm.xlu0 %2758, %v1477_v8   ;;  %4907 = vst [vmem:[#allocation113_spill] sm:$0xff] %v4155_v23  ;;  %v1483_v23 = vadd.f32 %v3925_v37, %v4915_v20  ;;  %v1484_v37 = vadd.f32 %v3919_v28, %v4918_v36  ;;  %v4922_v28 = vld [vmem:[#allocation53_spill] sm:$0xff]  ;;  %v4923_v36 = vld [vmem:[#allocation54_spill] sm:$0xff] }
 0x299   :  { %v4157_v42 = vpop.permute.xlu1 %1278  ;;  %1854 = vperm.xlu1 %2759, %v1476_v13  }
 0x29a   :  { %4908 = vst [vmem:[#allocation14_spill] sm:$0xff] %v4157_v42  ;;  %1863 = vperm.xlu0 %2758, %v1479_v19  }
 0x29d   :  { %v4163_v38 = vpop.permute.xlu1 %1286  ;;  %1860 = vperm.xlu1 %2759, %v1478_v31   ;;  %v4165_v8 = vpop.permute.xlu0 %1674  ;;  %v1485_v31 = vadd.f32 %v3933_v0, %v4917_v63  ;;  %v1486_v0 = vadd.f32 %v3927_v58, %v4920_v61  ;;  %v4924_v58 = vld [vmem:[#allocation55_spill] sm:$0xff]  ;;  %v4925_v61 = vld [vmem:[#allocation56_spill] sm:$0xff] }
 0x29e   :  { %4912 = vst [vmem:[#allocation117_spill] sm:$0xff] %v4163_v38  ;;  %1869 = vperm.xlu0 %2758, %v1481_v24  }
 0x2a1   :  { %v4171_v13 = vpop.permute.xlu1 %1677  ;;  %1866 = vperm.xlu1 %2759, %v1480_v12   ;;  %v4173_v19 = vpop.permute.xlu0 %1683  ;;  %v1487_v12 = vadd.f32 %v3941_v50, %v4919_v18  ;;  %v1488_v50 = vadd.f32 %v3935_v4, %v4922_v28  ;;  %v4927_v4 = vld [vmem:[#allocation57_spill] sm:$0xff]  ;;  %v4928_v28 = vld [vmem:[#allocation58_spill] sm:$0xff] }
 0x2a2   :  { %1875 = vperm.xlu0 %2758, %v1483_v23  }
 0x2a5   :  { %v4179_v25 = vpop.permute.xlu1 %1680  ;;  %1872 = vperm.xlu1 %2759, %v1482_v51   ;;  %v4181_v24 = vpop.permute.xlu0 %1689  ;;  %v1489_v51 = vadd.f32 %v3949_v49, %v4921_v1  ;;  %v1490_v49 = vadd.f32 %v3943_v9, %v4924_v58  ;;  %v4930_v9 = vld [vmem:[#allocation59_spill] sm:$0xff]  ;;  %v4931_v58 = vld [vmem:[#allocation60_spill] sm:$0xff] }
 0x2a6   :  { %1881 = vperm.xlu0 %2758, %v1485_v31  }
 0x2a9   :  { %v4187_v20 = vpop.permute.xlu1 %1686  ;;  %1878 = vperm.xlu1 %2759, %v1484_v37   ;;  %v4189_v23 = vpop.permute.xlu0 %1695  ;;  %v1491_v37 = vadd.f32 %v3957_v15, %v4923_v36  ;;  %v1492_v15 = vadd.f32 %v3951_v56, %v4927_v4 }
 0x2aa   :  { %1887 = vperm.xlu0 %2758, %v1487_v12  }
 0x2ad   :  { %v4195_v63 = vpop.permute.xlu1 %1692  ;;  %1884 = vperm.xlu1 %2759, %v1486_v0   ;;  %v4197_v31 = vpop.permute.xlu0 %1701  ;;  %v1493_v0 = vadd.f32 %v3965_v48, %v4925_v61  ;;  %v1494_v48 = vadd.f32 %v3959_v53, %v4930_v9  ;;  %v4932_v61 = vlaneseq  ;;  %v4935_v9 = vld [vmem:[#allocation5_spill] sm:$0xff] }
 0x2ae   :  { %1893 = vperm.xlu0 %2758, %v1489_v51  }
 0x2b1   :  { %v4203_v18 = vpop.permute.xlu1 %1698  ;;  %1890 = vperm.xlu1 %2759, %v1488_v50   ;;  %v4205_v12 = vpop.permute.xlu0 %1707  ;;  %v1495_v50 = vadd.f32 %v3973_v3, %v4928_v28  ;;  %v4933_v3 = vld [vmem:[#allocation61_spill] sm:$0xff]  ;;  %v4934_v28 = vld [vmem:[#allocation62_spill] sm:$0xff] }
 0x2b2   :  { %1899 = vperm.xlu0 %2758, %v1491_v37   ;;  %v1496_v4 = vadd.f32 %v3967_v14, %v4933_v3 }
 0x2b5   :  { %v4211_v1 = vpop.permute.xlu1 %1704  ;;  %1896 = vperm.xlu1 %2759, %v1490_v49   ;;  %v4213_v51 = vpop.permute.xlu0 %1713  ;;  %v1497_v49 = vadd.f32 %v3981_v41, %v4931_v58 }
 0x2b6   :  { %4926 = vst [vmem:[#allocation15_spill] sm:$0xff] %v4213_v51  ;;  %1905 = vperm.xlu0 %2758, %v1493_v0   ;;  %v4228_v0 = vand.u32 127, %v4932_v61 }
 0x2b8   :  { %v2070_v53 = vadd.s32 4294967280, %v4228_v0  ;;  %v4240_v41 = vsub.s32 %v4228_v0, %v4935_v9 }
 0x2b9   :  { %v4219_v36 = vpop.permute.xlu1 %1710  ;;  %1902 = vperm.xlu1 %2759, %v1492_v15   ;;  %v4221_v37 = vpop.permute.xlu0 %1719  ;;  %v2063_v15 = vadd.s32 4294967288, %v4228_v0 }
 0x2ba   :  { %4929 = vst [vmem:[#allocation114_spill] sm:$0xff] %v4221_v37  ;;  %1911 = vperm.xlu0 %2758, %v1495_v50   ;;  %v1499_v50 = vadd.f32 %v3989_v16, %v4934_v28  ;;  %v4937_v28 = vld [vmem:[#allocation64_spill] sm:$0xff]  ;;  %v4252_v30 = vsub.s32 %v2070_v53, %v4935_v9  ;;  %v2091_v53 = vadd.s32 4294967256, %v4228_v0 }
 0x2bb   :  { %v4246_v3 = vsub.s32 %v2063_v15, %v4935_v9  ;;  %v1501_v42 = vadd.f32 %v3997_v35, %v4937_v28  ;;  %v4939_v28 = vld [vmem:[#allocation66_spill] sm:$0xff] }
 0x2bd   :  { %v4230_v38 = vpop.permute.xlu1 %1716  ;;  %1908 = vperm.xlu1 %2759, %v1494_v48   ;;  %v1726_v56 = vpop.permute.xlu0 %1725  ;;  %v2077_v48 = vadd.s32 4294967272, %v4228_v0 }
 0x2be   :  { %1917 = vperm.xlu0 %2758, %v1497_v49   ;;  %v4936_v49 = vld [vmem:[#allocation63_spill] sm:$0xff]  ;;  %v2175_v45 = vrot.slane %v1726_v56, %v4246_v3  ;;  %v1503_v56 = vadd.f32 %v4005_v17, %v4939_v28  ;;  %v2112_v28 = vadd.s32 4294967232, %v4228_v0 }
 0x2bf   :  { %v1498_v14 = vadd.f32 %v3975_v62, %v4936_v49  ;;  %v4257_v62 = vsub.s32 %v2077_v48, %v4935_v9  ;;  %v2098_v48 = vadd.s32 4294967248, %v4228_v0 }
 0x2c1   :  { %v1723_v58 = vpop.permute.xlu1 %1722  ;;  %1914 = vperm.xlu1 %2759, %v1496_v4   ;;  %v1732_v61 = vpop.permute.xlu0 %1731  ;;  %v2084_v4 = vadd.s32 4294967264, %v4228_v0 }
 0x2c2   :  { %1923 = vperm.xlu0 %2758, %v1499_v50   ;;  %v2171_v16 = vrot.slane %v1723_v58, %v4240_v41  ;;  %v4938_v58 = vld [vmem:[#allocation65_spill] sm:$0xff] }
 0x2c3   :  { %v1500_v35 = vadd.f32 %v3983_v40, %v4938_v58  ;;  %v2105_v58 = vadd.s32 4294967240, %v4228_v0 }
 0x2c4   :  { %v2176_v49 = vsel %vm2068_vm1, %v2175_v45, %v2171_v16  ;;  %v4940_v16 = vld [vmem:[#allocation67_spill] sm:$0xff] }
 0x2c5   :  { %v1729_v37 = vpop.permute.xlu1 %1728  ;;  %1920 = vperm.xlu1 %2759, %v1498_v14   ;;  %v1738_v50 = vpop.permute.xlu0 %1737  ;;  %v4267_v14 = vsub.s32 %v2084_v4, %v4935_v9  ;;  %v1502_v17 = vadd.f32 %v3991_v27, %v4940_v16  ;;  %v4277_v4 = vsub.s32 %v2091_v53, %v4935_v9  ;;  %v4289_v53 = vsub.s32 %v2105_v58, %v4935_v9  ;;  %v4943_v16 = vld [vmem:[#allocation70_spill] sm:$0xff] }
 0x2c6   :  { %v2180_v15 = vrot.slane %v1729_v37, %v4252_v30  ;;  %1929 = vperm.xlu0 %2758, %v1501_v42   ;;  %v2185_v42 = vrot.slane %v1732_v61, %v4257_v62  ;;  %v2126_v58 = vadd.s32 4294967216, %v4228_v0 }
 0x2c8   :  { %v2181_v29 = vsel %vm2075_vm2, %v2180_v15, %v2176_v49  ;;  %v4941_v49 = vld [vmem:[#allocation68_spill] sm:$0xff] }
 0x2c9   :  { %v1735_v37 = vpop.permute.xlu1 %1734  ;;  %1926 = vperm.xlu1 %2759, %v1500_v35   ;;  %v1744_v40 = vpop.permute.xlu0 %1743  ;;  %v2186_v15 = vsel %vm2082_vm3, %v2185_v42, %v2181_v29  ;;  %v1505_v61 = vadd.f32 %v4013_v34, %v4941_v49  ;;  %v4283_v35 = vsub.s32 %v2098_v48, %v4935_v9  ;;  %v4942_v34 = vld [vmem:[#allocation69_spill] sm:$0xff]  ;;  %v2119_v42 = vadd.s32 4294967224, %v4228_v0 }
 0x2ca   :  { %v2190_v45 = vrot.slane %v1735_v37, %v4267_v14  ;;  %1935 = vperm.xlu0 %2758, %v1503_v56   ;;  %v2195_v56 = vrot.slane %v1738_v50, %v4277_v4  ;;  %v1504_v48 = vadd.f32 %v3999_v2, %v4942_v34  ;;  %v1507_v50 = vadd.f32 %v4021_v21, %v4943_v16  ;;  %v4945_v34 = vld [vmem:[#allocation72_spill] sm:$0xff] }
 0x2cc   :  { %v2191_v37 = vsel %vm2089_vm4, %v2190_v45, %v2186_v15 }
 0x2cd   :  { %v1741_v51 = vpop.permute.xlu1 %1740  ;;  %1932 = vperm.xlu1 %2759, %v1502_v17   ;;  %v1750_v27 = vpop.permute.xlu0 %1749  ;;  %v2196_v45 = vsel %vm2096_vm5, %v2195_v56, %v2191_v37  ;;  %v4299_v17 = vsub.s32 %v2112_v28, %v4935_v9  ;;  %v4944_v56 = vld [vmem:[#allocation71_spill] sm:$0xff]  ;;  %v4309_v28 = vsub.s32 %v2119_v42, %v4935_v9 }
 0x2ce   :  { %v2200_v29 = vrot.slane %v1741_v51, %v4283_v35  ;;  %1941 = vperm.xlu0 %2758, %v1505_v61   ;;  %v2205_v51 = vrot.slane %v1744_v40, %v4289_v53  ;;  %v2133_v61 = vadd.s32 4294967208, %v4228_v0  ;;  %v1506_v21 = vadd.f32 %v4007_v26, %v4944_v56  ;;  %v4947_v56 = vld [vmem:[#allocation74_spill] sm:$0xff] }
 0x2cf   :  { %v1509_v40 = vadd.f32 %v4029_v10, %v4945_v34  ;;  %v4946_v10 = vld [vmem:[#allocation73_spill] sm:$0xff]  ;;  %v2161_v34 = vadd.s32 4294967176, %v4228_v0 }
 0x2d0   :  { %v2201_v15 = vsel %vm2103_vm6, %v2200_v29, %v2196_v45  ;;  %v2140_v45 = vadd.s32 4294967200, %v4228_v0  ;;  %v4321_v42 = vsub.s32 %v2133_v61, %v4935_v9  ;;  %v2154_v61 = vadd.s32 4294967184, %v4228_v0 }
 0x2d1   :  { %v1747_v49 = vpop.permute.xlu1 %1746  ;;  %1938 = vperm.xlu1 %2759, %v1504_v48   ;;  %v1756_v2 = vpop.permute.xlu0 %1755  ;;  %v2206_v29 = vsel %vm2110_vm7, %v2205_v51, %v2201_v15  ;;  %v4315_v48 = vsub.s32 %v2126_v58, %v4935_v9  ;;  %v1508_v58 = vadd.f32 %v4015_v47, %v4946_v10  ;;  %v2147_v51 = vadd.s32 4294967192, %v4228_v0  ;;  %v4949_v10 = vld [vmem:[#allocation76_spill] sm:$0xff] }
 0x2d2   :  { %v2210_v37 = vrot.slane %v1747_v49, %v4299_v17  ;;  %1947 = vperm.xlu0 %2758, %v1507_v50   ;;  %v2215_v50 = vrot.slane %v1750_v27, %v4309_v28  ;;  %v1511_v27 = vadd.f32 %v4037_v5, %v4947_v56  ;;  %v1513_v0 = vadd.f32 %v4045_v46, %v4949_v10 }
 0x2d4   :  { %v2211_v16 = vsel %vm2117_vm8, %v2210_v37, %v2206_v29 }
 0x2d5   :  { %v1753_v49 = vpop.permute.xlu1 %1752  ;;  %1944 = vperm.xlu1 %2759, %v1506_v21   ;;  %v1762_v26 = vpop.permute.xlu0 %1761  ;;  %v2216_v37 = vsel %vm2124_vm9, %v2215_v50, %v2211_v16  ;;  %v4331_v21 = vsub.s32 %v2140_v45, %v4935_v9  ;;  %v4948_v50 = vld [vmem:[#allocation75_spill] sm:$0xff]  ;;  %v4341_v45 = vsub.s32 %v2147_v51, %v4935_v9 }
 0x2d6   :  { %v2220_v15 = vrot.slane %v1753_v49, %v4315_v48  ;;  %1953 = vperm.xlu0 %2758, %v1509_v40   ;;  %v2225_v40 = vrot.slane %v1756_v2, %v4321_v42  ;;  %v1510_v5 = vadd.f32 %v4023_v22, %v4948_v50  ;;  %v4347_v2 = vsub.s32 %v2154_v61, %v4935_v9 }
 0x2d7   :  { %v2235_v56 = vrot.slane %v1762_v26, %v4341_v45  ;;  %v2067_v26 = vrot.slane %v4171_v13, %v4246_v3  ;;  %v4952_v13 = vld [vmem:[#allocation79_spill] sm:$0xff] }
 0x2d8   :  { %v2221_v29 = vsel %vm2131_vm10, %v2220_v15, %v2216_v37  ;;  %v4351_v37 = vsub.s32 %v2161_v34, %v4935_v9  ;;  %v1514_v10 = vadd.f32 %v4039_v6, %v4952_v13 }
 0x2d9   :  { %v1759_v47 = vpop.permute.xlu1 %1758  ;;  %1950 = vperm.xlu1 %2759, %v1508_v58   ;;  %v1768_v49 = vpop.permute.xlu0 %1767  ;;  %v2226_v15 = vsel %vm2138_vm11, %v2225_v40, %v2221_v29  ;;  %v4950_v29 = vld [vmem:[#allocation77_spill] sm:$0xff] }
 0x2da   :  { %v2230_v16 = vrot.slane %v1759_v47, %v4331_v21  ;;  %1959 = vperm.xlu0 %2758, %v1511_v27   ;;  %v1512_v46 = vadd.f32 %v4031_v39, %v4950_v29  ;;  %v2245_v61 = vrot.slane %v1768_v49, %v4351_v37  ;;  %v4951_v47 = vld [vmem:[#allocation78_spill] sm:$0xff]  ;;  %v2081_v29 = vrot.slane %v4173_v19, %v4257_v62 }
 0x2db   :  { %v1515_v9 = vadd.f32 %v4053_v11, %v4951_v47  ;;  %v2102_v19 = vrot.slane %v4195_v63, %v4283_v35 }
 0x2dc   :  { %v2231_v58 = vsel %vm4686_vm12, %v2230_v16, %v2226_v15  ;;  %v2074_v16 = vrot.slane %v4179_v25, %v4252_v30 }
 0x2dd   :  { %v1765_v22 = vpop.permute.xlu1 %1764  ;;  %1956 = vperm.xlu1 %2759, %v1510_v5   ;;  %v1774_v51 = vpop.permute.xlu0 %1773  ;;  %v2236_v40 = vsel %vm2152_vm13, %v2235_v56, %v2231_v58  ;;  %v2062_v5 = vrot.slane %v4165_v8, %v4240_v41  ;;  %v2088_v8 = vrot.slane %v4187_v20, %v4267_v14 }
 0x2de   :  { %v2240_v27 = vrot.slane %v1765_v22, %v4347_v2  ;;  %1965 = vperm.xlu0 %2758, %v1513_v0   ;;  %v2254_v11 = vrot.slane %v1774_v51, %v4246_v3  ;;  %v4953_v0 = vld [vmem:[#allocation80_spill] sm:$0xff] }
 0x2df   :  { %v1517_v25 = vadd.f32 %v4061_v44, %v4953_v0  ;;  %v2069_v58 = vsel %vm2068_vm1, %v2067_v26, %v2062_v5 }
 0x2e0   :  { %v2241_v34 = vsel %vm2159_vm14, %v2240_v27, %v2236_v40  ;;  %v2076_v22 = vsel %vm2075_vm2, %v2074_v16, %v2069_v58  ;;  %v4955_v40 = vld [vmem:[#allocation82_spill] sm:$0xff] }
 0x2e1   :  { %v4367_v50 = vsel %vm2166_vm15, %v2245_v61, %v2241_v34  ;;  %v1771_v39 = vpop.permute.xlu1 %1770  ;;  %1962 = vperm.xlu1 %2759, %v1512_v46   ;;  %v1780_v49 = vpop.permute.xlu0 %1779  ;;  %v4954_v46 = vld [vmem:[#allocation81_spill] sm:$0xff]  ;;  %v1519_v47 = vadd.f32 %v4069_v33, %v4955_v40  ;;  %v4956_v33 = vld [vmem:[#allocation83_spill] sm:$0xff] }
 0x2e2   :  { %v2250_v15 = vrot.slane %v1771_v39, %v4240_v41  ;;  %1971 = vperm.xlu0 %2758, %v1515_v9   ;;  %v1516_v44 = vadd.f32 %v4047_v54, %v4954_v46  ;;  %v2264_v61 = vrot.slane %v1780_v49, %v4257_v62  ;;  %v2083_v9 = vsel %vm2082_vm3, %v2081_v29, %v2076_v22 }
 0x2e3   :  { %v2090_v26 = vsel %vm2089_vm4, %v2088_v8, %v2083_v9  ;;  %v2095_v54 = vrot.slane %v4181_v24, %v4277_v4  ;;  %v1518_v5 = vadd.f32 %v4055_v32, %v4956_v33  ;;  %v2116_v24 = vrot.slane %v4203_v18, %v4299_v17 }
 0x2e4   :  { %v2255_v56 = vsel %vm2068_vm1, %v2254_v11, %v2250_v15  ;;  %v4957_v15 = vld [vmem:[#allocation84_spill] sm:$0xff]  ;;  %v2109_v32 = vrot.slane %v4189_v23, %v4289_v53  ;;  %v2130_v23 = vrot.slane %v4211_v1, %v4315_v48 }
 0x2e5   :  { %v1777_v27 = vpop.permute.xlu1 %1776  ;;  %1968 = vperm.xlu1 %2759, %v1514_v10   ;;  %v1786_v51 = vpop.permute.xlu0 %1785  ;;  %v1521_v13 = vadd.f32 %v4077_v7, %v4957_v15  ;;  %v2097_v63 = vsel %vm2096_vm5, %v2095_v54, %v2090_v26  ;;  %v4958_v7 = vld [vmem:[#allocation85_spill] sm:$0xff]  ;;  %v4961_v26 = vld [vmem:[#allocation94_spill] sm:$0xff]  ;;  %v4963_v15 = vld [vmem:[#allocation96_spill] sm:$0xff] }
 0x2e6   :  { %v2259_v6 = vrot.slane %v1777_v27, %v4252_v30  ;;  %1977 = vperm.xlu0 %2758, %v1517_v25   ;;  %v2274_v11 = vrot.slane %v1786_v51, %v4277_v4  ;;  %v2104_v0 = vsel %vm2103_vm6, %v2102_v19, %v2097_v63  ;;  %v1520_v8 = vadd.f32 %v4063_v52, %v4958_v7  ;;  %v4959_v51 = vld [vmem:[#allocation92_spill] sm:$0xff] }
 0x2e7   :  { %v1529_v29 = vadd.f32 %v4109_v60, %v4959_v51  ;;  %v2111_v18 = vsel %vm2110_vm7, %v2109_v32, %v2104_v0  ;;  %v2123_v52 = vrot.slane %v4197_v31, %v4309_v28  ;;  %v4960_v60 = vld [vmem:[#allocation93_spill] sm:$0xff]  ;;  %v1531_v19 = vadd.f32 %v4117_v57, %v4961_v26  ;;  %v4962_v57 = vld [vmem:[#allocation95_spill] sm:$0xff]  ;;  %v4973_v26 = vld [vmem:[#allocation6_spill] sm:$0xff] }
 0x2e8   :  { %v2260_v20 = vsel %vm2075_vm2, %v2259_v6, %v2255_v56  ;;  %v2118_v46 = vsel %vm2117_vm8, %v2116_v24, %v2111_v18  ;;  %v1528_v9 = vadd.f32 %v4095_v55, %v4960_v60  ;;  %v2144_v31 = vrot.slane %v4219_v36, %v4331_v21  ;;  %v4966_v32 = vld [vmem:[#allocation9_spill] sm:$0xff] }
 0x2e9   :  { %v1783_v34 = vpop.permute.xlu1 %1782  ;;  %v2265_v16 = vsel %vm2082_vm3, %v2264_v61, %v2260_v20  ;;  %1974 = vperm.xlu1 %2759, %v1516_v44   ;;  %v1792_v39 = vpop.permute.xlu0 %1791  ;;  %v2125_v1 = vsel %vm2124_vm9, %v2123_v52, %v2118_v46  ;;  %v2137_v55 = vrot.slane %v4205_v12, %v4321_v42  ;;  %v2158_v12 = vrot.slane %v4230_v38, %v4347_v2  ;;  %v4970_v52 = vld [vmem:[#allocation99_spill] sm:$0xff] }
 0x2ea   :  { %v2269_v49 = vrot.slane %v1783_v34, %v4267_v14  ;;  %1983 = vperm.xlu0 %2758, %v1519_v47   ;;  %v2284_v27 = vrot.slane %v1792_v39, %v4289_v53 }
 0x2ec   :  { %v2270_v10 = vsel %vm2089_vm4, %v2269_v49, %v2265_v16  ;;  %v2132_v16 = vsel %vm2131_vm10, %v2130_v23, %v2125_v1 }
 0x2ed   :  { %v1789_v25 = vpop.permute.xlu1 %1788  ;;  %v2275_v58 = vsel %vm2096_vm5, %v2274_v11, %v2270_v10  ;;  %1980 = vperm.xlu1 %2759, %v1518_v5   ;;  %v1798_v56 = vpop.permute.xlu0 %1797  ;;  %v1530_v5 = vadd.f32 %v4103_v43, %v4962_v57  ;;  %v2139_v36 = vsel %vm2138_vm11, %v2137_v55, %v2132_v16  ;;  %v4964_v43 = vld [vmem:[#allocation15_spill] sm:$0xff]  ;;  %v4974_v57 = vld [vmem:[#allocation101_spill] sm:$0xff] }
 0x2ee   :  { %v2279_v22 = vrot.slane %v1789_v25, %v4283_v35  ;;  %1989 = vperm.xlu0 %2758, %v1521_v13   ;;  %v2294_v20 = vrot.slane %v1798_v56, %v4309_v28  ;;  %v1533_v13 = vadd.f32 %v4125_v59, %v4963_v15  ;;  %v2146_v10 = vsel %vm4686_vm12, %v2144_v31, %v2139_v36  ;;  %v4965_v59 = vld [vmem:[#allocation97_spill] sm:$0xff]  ;;  %v4976_v15 = vld [vmem:[#allocation86_spill] sm:$0xff] }
 0x2f0   :  { %v2280_v6 = vsel %vm2103_vm6, %v2279_v22, %v2275_v58  ;;  %v2151_v58 = vrot.slane %v4964_v43, %v4341_v45  ;;  %v1532_v22 = vadd.f32 %v4966_v32, %v4965_v59 }
 0x2f1   :  { %v1795_v44 = vpop.permute.xlu1 %1794  ;;  %v2285_v61 = vsel %vm2110_vm7, %v2284_v27, %v2280_v6  ;;  %1986 = vperm.xlu1 %2759, %v1520_v8   ;;  %v1804_v40 = vpop.permute.xlu0 %1803  ;;  %v4967_v8 = vld [vmem:[#allocation98_spill] sm:$0xff]  ;;  %v4968_v27 = vld [vmem:[#allocation11_spill] sm:$0xff] }
 0x2f2   :  { %v2289_v47 = vrot.slane %v1795_v44, %v4299_v17  ;;  %2013 = vperm.xlu0 %2758, %v1529_v29   ;;  %v2304_v11 = vrot.slane %v1804_v40, %v4321_v42  ;;  %v1535_v51 = vadd.f32 %v4968_v27, %v4967_v8  ;;  %v2153_v38 = vsel %vm2152_vm13, %v2151_v58, %v2146_v10  ;;  %v4969_v44 = vld [vmem:[#allocation114_spill] sm:$0xff]  ;;  %v4980_v58 = vld [vmem:[#allocation89_spill] sm:$0xff] }
 0x2f3   :  { %v2160_v18 = vsel %vm2159_vm14, %v2158_v12, %v2153_v38  ;;  %v4983_v38 = vld [vmem:[#allocation111_spill] sm:$0xff] }
 0x2f4   :  { %v2290_v34 = vsel %vm2117_vm8, %v2289_v47, %v2285_v61  ;;  %v2165_v61 = vrot.slane %v4969_v44, %v4351_v37  ;;  %v4971_v47 = vld [vmem:[#allocation109_spill] sm:$0xff] }
 0x2f5   :  { %v1801_v39 = vpop.permute.xlu1 %1800  ;;  %v2295_v54 = vsel %vm2124_vm9, %v2294_v20, %v2290_v34  ;;  %2010 = vperm.xlu1 %2759, %v1528_v9   ;;  %v1810_v49 = vpop.permute.xlu0 %1809  ;;  %v1534_v60 = vadd.f32 %v4971_v47, %v4970_v52  ;;  %v4972_v20 = vld [vmem:[#allocation87_spill] sm:$0xff] }
 0x2f6   :  { %v2299_v33 = vrot.slane %v1801_v39, %v4315_v48  ;;  %2019 = vperm.xlu0 %2758, %v1531_v19   ;;  %v2314_v7 = vrot.slane %v1810_v49, %v4341_v45  ;;  %v1522_v19 = vadd.f32 %v4973_v26, %v4972_v20  ;;  %v2167_v1 = vsel %vm2166_vm15, %v2165_v61, %v2160_v18 }
 0x2f7   :  { %v2722_v16 = vsel %vm2721_vm0, %v4367_v50, %v2167_v1  ;;  %v4989_v1 = vld [vmem:[#allocation108_spill] sm:$0xff]  ;;  %vm2725_vm0 = vcmask 1043459  }
 0x2f8   :  { %v2300_v63 = vsel %vm2131_vm10, %v2299_v33, %v2295_v54 }
 0x2f9   :  { %v1807_v0 = vpop.permute.xlu1 %1806  ;;  %v2305_v24 = vsel %vm2138_vm11, %v2304_v11, %v2300_v63  ;;  %2016 = vperm.xlu1 %2759, %v1530_v5   ;;  %v1816_v25 = vpop.permute.xlu0 %1815  ;;  %v4975_v5 = vld [vmem:[#allocation10_spill] sm:$0xff] }
 0x2fa   :  { %v2309_v56 = vrot.slane %v1807_v0, %v4331_v21  ;;  %2025 = vperm.xlu0 %2758, %v1533_v13   ;;  %v2324_v9 = vrot.slane %v1816_v25, %v4351_v37  ;;  %v1536_v11 = vadd.f32 %v4975_v5, %v4974_v57  ;;  %v4977_v13 = vld [vmem:[#allocation7_spill] sm:$0xff]  ;;  %v4978_v0 = vld [vmem:[#allocation100_spill] sm:$0xff] }
 0x2fb   :  { %v1523_v36 = vadd.f32 %v4977_v13, %v4976_v15  ;;  %v4991_v57 = vld [vmem:[#allocation115_spill] sm:$0xff]  ;;  %v4992_v15 = vld [vmem:[#allocation90_spill] sm:$0xff]  ;;  %v4993_v13 = vld [vmem:[#allocation112_spill] sm:$0xff] }
 0x2fc   :  { %v2310_v29 = vsel %vm4686_vm12, %v2309_v56, %v2305_v24  ;;  %vm2723_vm12 = vcmask 1042434   ;;  %v4979_v24 = vld [vmem:[#allocation12_spill] sm:$0xff]  ;;  %v4981_v56 = vld [vmem:[#allocation110_spill] sm:$0xff] }
 0x2fd   :  { %v1813_v6 = vpop.permute.xlu1 %1812  ;;  %v2315_v46 = vsel %vm2152_vm13, %v2314_v7, %v2310_v29  ;;  %2022 = vperm.xlu1 %2759, %v1532_v22   ;;  %v1822_v23 = vpop.permute.xlu0 %1821  ;;  %v1537_v25 = vadd.f32 %v4979_v24, %v4978_v0  ;;  %v1524_v59 = vadd.f32 %v4981_v56, %v4980_v58  ;;  %v4994_v24 = vld [vmem:[#allocation104_spill] sm:$0xff]  ;;  %v4996_v56 = vld [vmem:[#allocation106_spill] sm:$0xff] }
 0x2fe   :  { %v2319_v40 = vrot.slane %v1813_v6, %v4347_v2  ;;  %2031 = vperm.xlu0 %2758, %v1535_v51   ;;  %v2333_v55 = vrot.slane %v1822_v23, %v4246_v3  ;;  %v4982_v51 = vld [vmem:[#allocation103_spill] sm:$0xff]  ;;  %v4984_v6 = vld [vmem:[#allocation88_spill] sm:$0xff] }
 0x2ff   :  { %v1538_v29 = vadd.f32 %v4983_v38, %v4982_v51  ;;  %v4998_v38 = vld [vmem:[#allocation107_spill] sm:$0xff] }
 0x300   :  { %v2320_v34 = vsel %vm2159_vm14, %v2319_v40, %v2315_v46  ;;  %v4985_v46 = vld [vmem:[#allocation8_spill] sm:$0xff] }
 0x301   :  { %v2325_v31 = vsel %vm2166_vm15, %v2324_v9, %v2320_v34  ;;  %v1819_v39 = vpop.permute.xlu1 %1818  ;;  %2028 = vperm.xlu1 %2759, %v1534_v60   ;;  %v1828_v54 = vpop.permute.xlu0 %1827  ;;  %v1525_v23 = vadd.f32 %v4985_v46, %v4984_v6  ;;  %v4986_v60 = vld [vmem:[#allocation102_spill] sm:$0xff]  ;;  %v4987_v9 = vld [vmem:[#allocation13_spill] sm:$0xff] }
 0x302   :  { %v4476_v49 = vsel %vm2723_vm12, %v2325_v31, %v2722_v16  ;;  %v2329_v33 = vrot.slane %v1819_v39, %v4240_v41  ;;  %1992 = vperm.xlu0 %2758, %v1522_v19   ;;  %v2343_v43 = vrot.slane %v1828_v54, %v4257_v62  ;;  %v1539_v20 = vadd.f32 %v4987_v9, %v4986_v60  ;;  %v4988_v19 = vld [vmem:[#allocation91_spill] sm:$0xff] }
 0x303   :  { %v1526_v34 = vadd.f32 %v4989_v1, %v4988_v19  ;;  %vm5000_vm12 = vcmask 851712  }
 0x304   :  { %v2334_v50 = vsel %vm2068_vm1, %v2333_v55, %v2329_v33  ;;  %v4990_v33 = vld [vmem:[#allocation105_spill] sm:$0xff] }
 0x305   :  { %v1825_v63 = vpop.permute.xlu1 %1824  ;;  %2034 = vperm.xlu1 %2759, %v1536_v11   ;;  %v1834_v10 = vpop.permute.xlu0 %1833  ;;  %v1540_v5 = vadd.f32 %v4991_v57, %v4990_v33 }
 0x306   :  { %v2338_v12 = vrot.slane %v1825_v63, %v4252_v30  ;;  %1995 = vperm.xlu0 %2758, %v1523_v36   ;;  %v2353_v18 = vrot.slane %v1834_v10, %v4277_v4  ;;  %v1527_v36 = vadd.f32 %v4993_v13, %v4992_v15 }
 0x308   :  { %v2339_v32 = vsel %vm2075_vm2, %v2338_v12, %v2334_v50 }
 0x309   :  { %v1831_v22 = vpop.permute.xlu1 %1830  ;;  %v2344_v7 = vsel %vm2082_vm3, %v2343_v43, %v2339_v32  ;;  %2037 = vperm.xlu1 %2759, %v1537_v25   ;;  %v1840_v8 = vpop.permute.xlu0 %1839  ;;  %v4995_v25 = vld [vmem:[#allocation14_spill] sm:$0xff] }
 0x30a   :  { %v2348_v27 = vrot.slane %v1831_v22, %v4267_v14  ;;  %1998 = vperm.xlu0 %2758, %v1524_v59   ;;  %v2363_v26 = vrot.slane %v1840_v8, %v4289_v53  ;;  %v1541_v43 = vadd.f32 %v4995_v25, %v4994_v24  ;;  %v4997_v59 = vld [vmem:[#allocation117_spill] sm:$0xff] }
 0x30b   :  { %v1543_v32 = vadd.f32 %v4997_v59, %v4996_v56 }
 0x30c   :  { %v2349_v44 = vsel %vm2089_vm4, %v2348_v27, %v2344_v7 }
 0x30d   :  { %v1837_v61 = vpop.permute.xlu1 %1836  ;;  %v2354_v40 = vsel %vm2096_vm5, %v2353_v18, %v2349_v44  ;;  %2040 = vperm.xlu1 %2759, %v1538_v29   ;;  %v1846_v52 = vpop.permute.xlu0 %1845  ;;  %v4999_v29 = vld [vmem:[#allocation113_spill] sm:$0xff] }
 0x30e   :  { %v2358_v47 = vrot.slane %v1837_v61, %v4283_v35  ;;  %2001 = vperm.xlu0 %2758, %v1525_v23   ;;  %v2373_v11 = vrot.slane %v1846_v52, %v4309_v28  ;;  %v1542_v18 = vadd.f32 %v4999_v29, %v4998_v38 }
 0x310   :  { %v2359_v16 = vsel %vm2103_vm6, %v2358_v47, %v2354_v40 }
 0x311   :  { %v1843_v31 = vpop.permute.xlu1 %1842  ;;  %v2364_v39 = vsel %vm2110_vm7, %v2363_v26, %v2359_v16  ;;  %2043 = vperm.xlu1 %2759, %v1539_v20   ;;  %v1852_v54 = vpop.permute.xlu0 %1851 }
 0x312   :  { %v2368_v55 = vrot.slane %v1843_v31, %v4299_v17  ;;  %2004 = vperm.xlu0 %2758, %v1526_v34   ;;  %v2383_v58 = vrot.slane %v1852_v54, %v4321_v42 }
 0x314   :  { %v2369_v50 = vsel %vm2117_vm8, %v2368_v55, %v2364_v39 }
 0x315   :  { %v1849_v63 = vpop.permute.xlu1 %1848  ;;  %v2374_v10 = vsel %vm2124_vm9, %v2373_v11, %v2369_v50  ;;  %2046 = vperm.xlu1 %2759, %v1540_v5   ;;  %v1858_v12 = vpop.permute.xlu0 %1857 }
 0x316   :  { %v2378_v0 = vrot.slane %v1849_v63, %v4315_v48  ;;  %2007 = vperm.xlu0 %2758, %v1527_v36   ;;  %v2393_v6 = vrot.slane %v1858_v12, %v4341_v45 }
 0x318   :  { %v2379_v22 = vsel %vm2131_vm10, %v2378_v0, %v2374_v10 }
 0x319   :  { %v1855_v7 = vpop.permute.xlu1 %1854  ;;  %v2384_v8 = vsel %vm2138_vm11, %v2383_v58, %v2379_v22  ;;  %2049 = vperm.xlu1 %2759, %v1541_v43   ;;  %v1864_v27 = vpop.permute.xlu0 %1863 }
 0x31a   :  { %v2388_v51 = vrot.slane %v1855_v7, %v4331_v21  ;;  %2055 = vperm.xlu0 %2758, %v1543_v32   ;;  %v2403_v52 = vrot.slane %v1864_v27, %v4351_v37 }
 0x31c   :  { %v2389_v46 = vsel %vm5000_vm12, %v2388_v51, %v2384_v8 }
 0x31d   :  { %v1861_v23 = vpop.permute.xlu1 %1860  ;;  %v2394_v44 = vsel %vm2152_vm13, %v2393_v6, %v2389_v46  ;;  %2052 = vperm.xlu1 %2759, %v1542_v18   ;;  %v1870_v61 = vpop.permute.xlu0 %1869 }
 0x31e   :  { %v2398_v40 = vrot.slane %v1861_v23, %v4347_v2  ;;  %v2412_v19 = vrot.slane %v1870_v61, %v4246_v3 }
 0x320   :  { %v2399_v47 = vsel %vm2159_vm14, %v2398_v40, %v2394_v44 }
 0x321   :  { %v2404_v60 = vsel %vm2166_vm15, %v2403_v52, %v2399_v47  ;;  %v1867_v9 = vpop.permute.xlu1 %1866  ;;  %v1876_v20 = vpop.permute.xlu0 %1875 }
 0x322   :  { %v2726_v26 = vsel %vm2725_vm0, %v2404_v60, %v4476_v49  ;;  %v2408_v1 = vrot.slane %v1867_v9, %v4240_v41  ;;  %v2422_v54 = vrot.slane %v1876_v20, %v4257_v62  ;;  %vm2727_vm0 = vcmask 1044484  }
 0x324   :  { %v2413_v34 = vsel %vm2068_vm1, %v2412_v19, %v2408_v1 }
 0x325   :  { %v1873_v16 = vpop.permute.xlu1 %1872  ;;  %v1882_v31 = vpop.permute.xlu0 %1881 }
 0x326   :  { %v2417_v39 = vrot.slane %v1873_v16, %v4252_v30  ;;  %v2432_v11 = vrot.slane %v1882_v31, %v4277_v4 }
 0x328   :  { %v2418_v55 = vsel %vm2075_vm2, %v2417_v39, %v2413_v34 }
 0x329   :  { %v1879_v33 = vpop.permute.xlu1 %1878  ;;  %v2423_v57 = vsel %vm2082_vm3, %v2422_v54, %v2418_v55  ;;  %v1888_v5 = vpop.permute.xlu0 %1887 }
 0x32a   :  { %v2427_v49 = vrot.slane %v1879_v33, %v4267_v14  ;;  %v2442_v10 = vrot.slane %v1888_v5, %v4289_v53 }
 0x32c   :  { %v2428_v15 = vsel %vm2089_vm4, %v2427_v49, %v2423_v57 }
 0x32d   :  { %v1885_v13 = vpop.permute.xlu1 %1884  ;;  %v2433_v36 = vsel %vm2096_vm5, %v2432_v11, %v2428_v15  ;;  %v1894_v50 = vpop.permute.xlu0 %1893 }
 0x32e   :  { %v2437_v63 = vrot.slane %v1885_v13, %v4283_v35  ;;  %v2452_v58 = vrot.slane %v1894_v50, %v4309_v28 }
 0x330   :  { %v2438_v12 = vsel %vm2103_vm6, %v2437_v63, %v2433_v36 }
 0x331   :  { %v1891_v0 = vpop.permute.xlu1 %1890  ;;  %v2443_v24 = vsel %vm2110_vm7, %v2442_v10, %v2438_v12  ;;  %v1900_v25 = vpop.permute.xlu0 %1899 }
 0x332   :  { %v2447_v43 = vrot.slane %v1891_v0, %v4299_v17  ;;  %v2462_v8 = vrot.slane %v1900_v25, %v4321_v42 }
 0x334   :  { %v2448_v56 = vsel %vm2117_vm8, %v2447_v43, %v2443_v24 }
 0x335   :  { %v1897_v59 = vpop.permute.xlu1 %1896  ;;  %v2453_v32 = vsel %vm2124_vm9, %v2452_v58, %v2448_v56  ;;  %v1906_v22 = vpop.permute.xlu0 %1905 }
 0x336   :  { %v2457_v7 = vrot.slane %v1897_v59, %v4315_v48  ;;  %v2472_v6 = vrot.slane %v1906_v22, %v4341_v45 }
 0x338   :  { %v2458_v27 = vsel %vm2131_vm10, %v2457_v7, %v2453_v32 }
 0x339   :  { %v1903_v51 = vpop.permute.xlu1 %1902  ;;  %v2463_v38 = vsel %vm2138_vm11, %v2462_v8, %v2458_v27  ;;  %v1912_v29 = vpop.permute.xlu0 %1911 }
 0x33a   :  { %v2467_v18 = vrot.slane %v1903_v51, %v4331_v21  ;;  %v2482_v52 = vrot.slane %v1912_v29, %v4351_v37 }
 0x33c   :  { %v2468_v46 = vsel %vm5000_vm12, %v2467_v18, %v2463_v38 }
 0x33d   :  { %v1909_v23 = vpop.permute.xlu1 %1908  ;;  %v2473_v44 = vsel %vm2152_vm13, %v2472_v6, %v2468_v46  ;;  %v1918_v61 = vpop.permute.xlu0 %1917 }
 0x33e   :  { %v2477_v40 = vrot.slane %v1909_v23, %v4347_v2  ;;  %v2491_v1 = vrot.slane %v1918_v61, %v4246_v3 }
 0x340   :  { %v2478_v47 = vsel %vm2159_vm14, %v2477_v40, %v2473_v44 }
 0x341   :  { %v2483_v60 = vsel %vm2166_vm15, %v2482_v52, %v2478_v47  ;;  %v1915_v9 = vpop.permute.xlu1 %1914  ;;  %v1924_v20 = vpop.permute.xlu0 %1923 }
 0x342   :  { %v2728_v19 = vsel %vm2727_vm0, %v2483_v60, %v2726_v26  ;;  %v2487_v34 = vrot.slane %v1915_v9, %v4240_v41  ;;  %v2501_v55 = vrot.slane %v1924_v20, %v4257_v62  ;;  %vm2729_vm0 = vcmask 1045509  }
 0x344   :  { %v2492_v16 = vsel %vm2068_vm1, %v2491_v1, %v2487_v34 }
 0x345   :  { %v1921_v31 = vpop.permute.xlu1 %1920  ;;  %v1930_v39 = vpop.permute.xlu0 %1929 }
 0x346   :  { %v2496_v54 = vrot.slane %v1921_v31, %v4252_v30  ;;  %v2511_v11 = vrot.slane %v1930_v39, %v4277_v4 }
 0x348   :  { %v2497_v33 = vsel %vm2075_vm2, %v2496_v54, %v2492_v16 }
 0x349   :  { %v1927_v57 = vpop.permute.xlu1 %1926  ;;  %v2502_v5 = vsel %vm2082_vm3, %v2501_v55, %v2497_v33  ;;  %v1936_v49 = vpop.permute.xlu0 %1935 }
 0x34a   :  { %v2506_v26 = vrot.slane %v1927_v57, %v4267_v14  ;;  %v2521_v10 = vrot.slane %v1936_v49, %v4289_v53 }
 0x34c   :  { %v2507_v15 = vsel %vm2089_vm4, %v2506_v26, %v2502_v5 }
 0x34d   :  { %v1933_v13 = vpop.permute.xlu1 %1932  ;;  %v2512_v36 = vsel %vm2096_vm5, %v2511_v11, %v2507_v15  ;;  %v1942_v50 = vpop.permute.xlu0 %1941 }
 0x34e   :  { %v2516_v63 = vrot.slane %v1933_v13, %v4283_v35  ;;  %v2531_v58 = vrot.slane %v1942_v50, %v4309_v28 }
 0x350   :  { %v2517_v12 = vsel %vm2103_vm6, %v2516_v63, %v2512_v36 }
 0x351   :  { %v1939_v0 = vpop.permute.xlu1 %1938  ;;  %v2522_v24 = vsel %vm2110_vm7, %v2521_v10, %v2517_v12  ;;  %v1948_v25 = vpop.permute.xlu0 %1947 }
 0x352   :  { %v2526_v43 = vrot.slane %v1939_v0, %v4299_v17  ;;  %v2541_v8 = vrot.slane %v1948_v25, %v4321_v42 }
 0x354   :  { %v2527_v56 = vsel %vm2117_vm8, %v2526_v43, %v2522_v24 }
 0x355   :  { %v1945_v59 = vpop.permute.xlu1 %1944  ;;  %v2532_v32 = vsel %vm2124_vm9, %v2531_v58, %v2527_v56  ;;  %v1954_v22 = vpop.permute.xlu0 %1953 }
 0x356   :  { %v2536_v7 = vrot.slane %v1945_v59, %v4315_v48  ;;  %v2551_v6 = vrot.slane %v1954_v22, %v4341_v45 }
 0x358   :  { %v2537_v27 = vsel %vm2131_vm10, %v2536_v7, %v2532_v32 }
 0x359   :  { %v1951_v51 = vpop.permute.xlu1 %1950  ;;  %v2542_v38 = vsel %vm2138_vm11, %v2541_v8, %v2537_v27  ;;  %v1960_v29 = vpop.permute.xlu0 %1959 }
 0x35a   :  { %v2546_v18 = vrot.slane %v1951_v51, %v4331_v21  ;;  %v2561_v52 = vrot.slane %v1960_v29, %v4351_v37 }
 0x35c   :  { %v2547_v46 = vsel %vm5000_vm12, %v2546_v18, %v2542_v38 }
 0x35d   :  { %v1957_v23 = vpop.permute.xlu1 %1956  ;;  %v2552_v44 = vsel %vm2152_vm13, %v2551_v6, %v2547_v46  ;;  %v1966_v61 = vpop.permute.xlu0 %1965 }
 0x35e   :  { %v2556_v40 = vrot.slane %v1957_v23, %v4347_v2  ;;  %v2570_v0 = vrot.slane %v1966_v61, %v4246_v3 }
 0x360   :  { %v2557_v47 = vsel %vm2159_vm14, %v2556_v40, %v2552_v44 }
 0x361   :  { %v2562_v60 = vsel %vm2166_vm15, %v2561_v52, %v2557_v47  ;;  %v1963_v9 = vpop.permute.xlu1 %1962  ;;  %v1972_v20 = vpop.permute.xlu0 %1971 }
 0x362   :  { %v4598_v1 = vsel %vm2729_vm0, %v2562_v60, %v2728_v19  ;;  %v2566_v63 = vrot.slane %v1963_v9, %v4240_v41  ;;  %v2580_v32 = vrot.slane %v1972_v20, %v4257_v62 }
 0x364   :  { %v2571_v24 = vsel %vm2068_vm1, %v2570_v0, %v2566_v63 }
 0x365   :  { %v1969_v34 = vpop.permute.xlu1 %1968  ;;  %v1978_v16 = vpop.permute.xlu0 %1977 }
 0x366   :  { %v2575_v19 = vrot.slane %v1969_v34, %v4252_v30 }
 0x368   :  { %v2576_v25 = vsel %vm2075_vm2, %v2575_v19, %v2571_v24 }
 0x369   :  { %v1975_v31 = vpop.permute.xlu1 %1974  ;;  %v1984_v39 = vpop.permute.xlu0 %1983  ;;  %v2581_v8 = vsel %vm2082_vm3, %v2580_v32, %v2576_v25 }
 0x36a   :  { %v2585_v43 = vrot.slane %v1975_v31, %v4267_v14  ;;  %v2600_v47 = vrot.slane %v1984_v39, %v4289_v53 }
 0x36c   :  { %v2586_v27 = vsel %vm2089_vm4, %v2585_v43, %v2581_v8 }
 0x36d   :  { %v1981_v54 = vpop.permute.xlu1 %1980  ;;  %v1990_v55 = vpop.permute.xlu0 %1989 }
 0x36e   :  { %v2595_v51 = vrot.slane %v1981_v54, %v4283_v35  ;;  %v2610_v54 = vrot.slane %v1990_v55, %v4309_v28 }
 0x371   :  { %v1987_v33 = vpop.permute.xlu1 %1986  ;;  %v2014_v57 = vpop.permute.xlu0 %2013 }
 0x372   :  { %v2649_v7 = vrot.slane %v2014_v57, %v4246_v3  ;;  %v2605_v44 = vrot.slane %v1987_v33, %v4299_v17 }
 0x375   :  { %v2011_v5 = vpop.permute.xlu1 %2010  ;;  %v2020_v49 = vpop.permute.xlu0 %2019 }
 0x376   :  { %v2645_v58 = vrot.slane %v2011_v5, %v4240_v41  ;;  %v2590_v41 = vrot.slane %v1978_v16, %v4277_v4 }
 0x378   :  { %v2650_v38 = vsel %vm2068_vm1, %v2649_v7, %v2645_v58  ;;  %v2591_v3 = vsel %vm2096_vm5, %v2590_v41, %v2586_v27  ;;  %vm5001_vm1 = vmmov %vm5000_vm12 }
 0x379   :  { %v2017_v26 = vpop.permute.xlu1 %2016  ;;  %v2026_v11 = vpop.permute.xlu0 %2025  ;;  %v2596_v23 = vsel %vm2103_vm6, %v2595_v51, %v2591_v3 }
 0x37a   :  { %v2654_v22 = vrot.slane %v2017_v26, %v4252_v30  ;;  %v2659_v30 = vrot.slane %v2020_v49, %v4257_v62  ;;  %v2601_v62 = vsel %vm2110_vm7, %v2600_v47, %v2596_v23 }
 0x37b   :  { %v2606_v20 = vsel %vm2117_vm8, %v2605_v44, %v2601_v62 }
 0x37c   :  { %v2655_v6 = vsel %vm2075_vm2, %v2654_v22, %v2650_v38  ;;  %v2611_v26 = vsel %vm2124_vm9, %v2610_v54, %v2606_v20  ;;  %vm5002_vm2 = vmmov %vm5001_vm1 }
 0x37d   :  { %v2023_v15 = vpop.permute.xlu1 %2022  ;;  %v2032_v13 = vpop.permute.xlu0 %2031  ;;  %v2660_v61 = vsel %vm2082_vm3, %v2659_v30, %v2655_v6  ;;  %vm2731_vm3 = vcmask 1046534  }
 0x37e   :  { %v2664_v46 = vrot.slane %v2023_v15, %v4267_v14  ;;  %v2669_v14 = vrot.slane %v2026_v11, %v4277_v4  ;;  %v2679_v4 = vrot.slane %v2032_v13, %v4289_v53 }
 0x380   :  { %v2665_v60 = vsel %vm2089_vm4, %v2664_v46, %v2660_v61  ;;  %vm2733_vm4 = vcmask 1047559  }
 0x381   :  { %v2029_v36 = vpop.permute.xlu1 %2028  ;;  %v1993_v50 = vpop.permute.xlu0 %1992  ;;  %v2670_v34 = vsel %vm2096_vm5, %v2669_v14, %v2665_v60 }
 0x382   :  { %v2674_v9 = vrot.slane %v2029_v36, %v4283_v35  ;;  %v2615_v16 = vrot.slane %v1993_v50, %v4315_v48 }
 0x384   :  { %v2675_v33 = vsel %vm2103_vm6, %v2674_v9, %v2670_v34  ;;  %v2616_v55 = vsel %vm2131_vm10, %v2615_v16, %v2611_v26 }
 0x385   :  { %v2035_v10 = vpop.permute.xlu1 %2034  ;;  %v1996_v12 = vpop.permute.xlu0 %1995  ;;  %v2680_v36 = vsel %vm2110_vm7, %v2679_v4, %v2675_v33 }
 0x386   :  { %v2684_v39 = vrot.slane %v2035_v10, %v4299_v17  ;;  %v2620_v57 = vrot.slane %v1996_v12, %v4321_v42 }
 0x388   :  { %v2685_v53 = vsel %vm2117_vm8, %v2684_v39, %v2680_v36 }
 0x389   :  { %v2038_v56 = vpop.permute.xlu1 %2037  ;;  %v1999_v59 = vpop.permute.xlu0 %1998 }
 0x38a   :  { %v2689_v5 = vrot.slane %v2038_v56, %v4309_v28  ;;  %v2625_v49 = vrot.slane %v1999_v59, %v4331_v21  ;;  %v2621_v28 = vsel %vm2138_vm11, %v2620_v57, %v2616_v55 }
 0x38c   :  { %v2690_v10 = vsel %vm2124_vm9, %v2689_v5, %v2685_v53  ;;  %v2626_v12 = vsel %vm5001_vm1, %v2625_v49, %v2621_v28 }
 0x38d   :  { %v2041_v29 = vpop.permute.xlu1 %2040  ;;  %v2002_v18 = vpop.permute.xlu0 %2001 }
 0x38e   :  { %v2694_v11 = vrot.slane %v2041_v29, %v4315_v48  ;;  %v2630_v15 = vrot.slane %v2002_v18, %v4341_v45  ;;  %v1544_v48 = vld [vmem:[%s4681_s3] sm:$0xff]  ;;  %s2787_s3 = smov [#allocation2]  }
 0x38f   :  { %v2737_v56 = vsub.f32 1.0, %v1544_v48  ;;  %s2747_s5 = sshll.u32 %s2787_s3, 4  ;;  %s2748_s5 = int_to_ptr.vmem [resolvable:$true] %s2747_s5 }
 0x390   :  { %v2695_v0 = vsel %vm2131_vm10, %v2694_v11, %v2690_v10  ;;  %v2631_v24 = vsel %vm2152_vm13, %v2630_v15, %v2626_v12  ;;  %s2761_s6 = scalar_lea.vmem %s2748_s5, 128  ;;  %p2766_p1 = scmp.lt.s32.totalorder %s2748_s5, %s2748_s5 }
 0x391   :  { %v2044_v40 = vpop.permute.xlu1 %2043  ;;  %v2005_v52 = vpop.permute.xlu0 %2004  ;;  %v2738_v38 = vmul.f32 1e+20, %v2737_v56  ;;  %p2762_p0 = scmp.ne.s32.totalorder %s2748_s5, %s2761_s6  ;;  %p2767_p2 = scmp.lt.s32.totalorder %s2761_s6, %s2761_s6 }
 0x392   :  { %v2699_v17 = vrot.slane %v2044_v40, %v4321_v42  ;;  %v2635_v50 = vrot.slane %v2005_v52, %v4347_v2 }
 0x393   :  { %p2768_p3 = por %p2767_p2, %p2766_p1 }
 0x394   :  { %v2700_v43 = vsel %vm2138_vm11, %v2699_v17, %v2695_v0 }
 0x395   :  { %v2047_v31 = vpop.permute.xlu1 %2046  ;;  %v2008_v35 = vpop.permute.xlu0 %2007  ;;  %p2769_p4 = pnand %p2768_p3, %p2762_p0 }
 0x396   :  { %v2704_v13 = vrot.slane %v2047_v31, %v4331_v21  ;;  %v2640_v19 = vrot.slane %v2008_v35, %v4351_v37  ;;  %v2636_v21 = vsel %vm2159_vm14, %v2635_v50, %v2631_v24 }
 0x398   :  { %v2705_v59 = vsel %vm5002_vm2, %v2704_v13, %v2700_v43  ;;  %v2641_v32 = vsel %vm2166_vm15, %v2640_v19, %v2636_v21 }
 0x399   :  { %v2050_v63 = vpop.permute.xlu1 %2049  ;;  %v2056_v25 = vpop.permute.xlu0 %2055  ;;  %v2732_v27 = vsel %vm2731_vm3, %v2641_v32, %v4598_v1 }
 0x39a   :  { %v2709_v42 = vrot.slane %v2050_v63, %v4341_v45  ;;  %v2719_v7 = vrot.slane %v2056_v25, %v4351_v37 }
 0x39c   :  { %v2710_v45 = vsel %vm2152_vm13, %v2709_v42, %v2705_v59 }
 0x39d   :  { %v2053_v58 = vpop.permute.xlu1 %2052 }
 0x39e   :  { %v2714_v22 = vrot.slane %v2053_v58, %v4347_v2 }
 0x3a0   :  { %v2715_v8 = vsel %vm2159_vm14, %v2714_v22, %v2710_v45 }
 0x3a1   :  { %v2720_v51 = vsel %vm2166_vm15, %v2719_v7, %v2715_v8 }
 0x3a2   :  { %v2734_v29 = vsel %vm2733_vm4, %v2720_v51, %v2732_v27 }
 0x3a3   :  { %v2736_v18 = vmul.f32 %v2734_v29, %v1544_v48 }
 0x3a5   :  { %v2739_v41 = vsub.f32 %v2736_v18, %v2738_v38 }
 0x3a7   :  { %2740 = vst [vmem:[#allocation2] sm:$0xff] %v2739_v41 }
 0x3a8   :  { %2772 = shalt.err (!%p2769_p4)
}
 0x3a9   :  { %s2773_s9 = scalar_lea.hbm %s4682_s4, 128 }
 0x3aa   :  { %p2774_p5 = scmp.ne.s32.totalorder %s4682_s4, %s2773_s9  ;;  %p2777_p6 = scmp.lt.u32.totalorder %s2773_s9, %s4682_s4 }
 0x3ac   :  { %p2779_p7 = pnand %p2777_p6, %p2774_p5 }
 0x3ae   :  { %2782 = shalt.err (!%p2779_p7)
}
 0x3af   :  { %2750 = dma.vmem_to_hbm [thread:$0]  %s2748_s5, 128, %s4682_s4, [#allocation3]  }
 0x3b0   :  { %2783 = dma.done.wait [#allocation3], 128  }
 0x3b1   :  { %2784 = vsyncadd [#allocation3], 4294967168 }
 0x3b2   :  { %2754 = vsyncpa [#allocation3], 1 }

</bundles_post_ra>
